<compile_context>
chip_gen: v7x
topology: tpu7x:2x2x1
jax: 0.10.0
libtpu: 0.0.40
codegen_flags: <defaults>
</compile_context>

<pallas_src>
import functools

import jax
import jax.numpy as jnp
from jax.experimental import pallas as pl
from jax.experimental.pallas import tpu as pltpu

CORE_LOSS_KEY = "core_loss"

# exp/log1p/sigmoid of this pad value are exactly 0 -> padded pixels
# contribute exactly 0 to every accumulator (focal, dice sums, IoU counts).
_PAD_LOGIT = -1e9


# ----------------------------------------------------------------------------
# Pallas kernel: per-group focal / dice / actual-IoU reductions over H*W
# ----------------------------------------------------------------------------
def _mask_losses_kernel(src_ref, tgt_ref, out_ref,
                        facc, sacc, pacc, qacc, iacc, tacc, gacc,
                        *, rb, hw_total, num_objects,
                        focal_alpha, focal_gamma, tgt_resident):
    """Grid = (T, N, S, K); K is the reduction axis over the H*W pixels.

    Block shapes:
      src_ref : (1, 1, 1, M, Rb, 128)  mask-logit tile (full sublane occupancy)
      tgt_ref : (1, 1, Rp, 128) [resident]  or  (1, 1, Rb, 128) [tiled]
      out_ref : (1, 1, 1, M, 3)  (focal, dice, actual_iou), written at last K
      scratch : five (M, 8, 128) + two (8, 128) f32 partial-sum accumulators
    """
    k = pl.program_id(3)

    @pl.when(k == 0)
    def _init():
        facc[...] = jnp.zeros_like(facc)
        sacc[...] = jnp.zeros_like(sacc)
        pacc[...] = jnp.zeros_like(pacc)
        qacc[...] = jnp.zeros_like(qacc)
        iacc[...] = jnp.zeros_like(iacc)
        tacc[...] = jnp.zeros_like(tacc)
        gacc[...] = jnp.zeros_like(gacc)

    x = src_ref[0, 0, 0].astype(jnp.float32)                     # (M, Rb, 128)
    if tgt_resident:
        start = pl.multiple_of(k * rb, rb)
        t = tgt_ref[0, 0, pl.ds(start, rb), :].astype(jnp.float32)  # (Rb, 128)
    else:
        t = tgt_ref[0, 0].astype(jnp.float32)                       # (Rb, 128)

    # --- target-only terms: computed once per tile, broadcast over M --------
    gt = (t > 0.0).astype(jnp.float32)          # binarised GT for IoU counts
    alpha_t = None
    if focal_alpha >= 0:
        # alpha*t + (1-alpha)*(1-t) == (1-alpha) + (2*alpha-1)*t
        alpha_t = (1.0 - focal_alpha) + (2.0 * focal_alpha - 1.0) * t

    # --- per-channel elementwise work (one shared exp / log1p per element) --
    e = jnp.exp(-jnp.abs(x))
    s = 1.0 / (1.0 + e)                          # sigmoid(|x|); exact divide
    prob = jnp.where(x >= 0.0, s, 1.0 - s)       # sigmoid(x)
    ce = jnp.maximum(x, 0.0) - x * t + jnp.log1p(e)   # BCE-with-logits

    pt_prod = prob * t
    one_minus_pt = prob + t - 2.0 * pt_prod      # == 1 - p_t

    g = float(focal_gamma)
    if g == 0.0:
        fl = ce
    elif g.is_integer() and 0 < g <= 8:
        mod = one_minus_pt
        for _ in range(int(g) - 1):
            mod = mod * one_minus_pt
        fl = ce * mod
    else:
        fl = ce * jnp.power(jnp.maximum(one_minus_pt, 0.0), g)
    if alpha_t is not None:
        fl = fl * alpha_t                         # (Rb,128) broadcast over M

    pred = (x > 0.0).astype(jnp.float32)
    pred_gt = pred * gt

    # --- deferred reduction: fold the Rb axis into 8 sublane rows with pure
    #     cross-vreg VPU adds; the cross-lane reduction happens only once per
    #     group, in the finalize branch below.
    def _part(a):                                 # (..., Rb, 128) -> (..., 8, 128)
        return a.reshape(a.shape[:-2] + (rb // 8, 8, 128)).sum(axis=-3)

    facc[...] += _part(fl)
    sacc[...] += _part(prob)
    pacc[...] += _part(pt_prod)
    qacc[...] += _part(pred)
    iacc[...] += _part(pred_gt)
    tacc[...] += _part(t)
    gacc[...] += _part(gt)

    @pl.when(k == pl.num_programs(3) - 1)
    def _finalize():
        def _red_m(a):                            # (M, 8, 128) -> (M, 1)
            return jnp.sum(jnp.sum(a, axis=-1, keepdims=True), axis=-2)

        def _red_1(a):                            # (8, 128) -> (1, 1)
            return jnp.sum(jnp.sum(a, axis=-1, keepdims=True), axis=-2,
                           keepdims=True)

        f_sum = _red_m(facc[...])
        s_sum = _red_m(sacc[...])
        p_sum = _red_m(pacc[...])
        q_sum = _red_m(qacc[...])
        i_sum = _red_m(iacc[...])
        t_sum = _red_1(tacc[...])
        g_sum = _red_1(gacc[...])

        inv_no = 1.0 / num_objects
        focal = f_sum * (inv_no / hw_total)
        dice = (1.0 - (2.0 * p_sum + 1.0) / (s_sum + t_sum + 1.0)) * inv_no
        union = q_sum + g_sum - i_sum
        aiou = i_sum / jnp.maximum(union, 1.0)

        out_ref[0, 0, 0, :, 0:1] = focal
        out_ref[0, 0, 0, :, 1:2] = dice
        out_ref[0, 0, 0, :, 2:3] = aiou


# ----------------------------------------------------------------------------
# Tiling / VMEM planning helpers
# ----------------------------------------------------------------------------
def _vmem_budget():
    """Generation-aware (tile_budget, vmem_limit_cap) in bytes."""
    cap = 64 * 1024 * 1024            # conservative fallback (v7x-sized VMEM)
    try:
        info = pltpu.get_tpu_info()
        cap = int(getattr(info, "vmem_capacity_bytes", cap) or cap)
    except Exception:
        pass
    tile_budget = min(cap // 4, 32 * 1024 * 1024)  # 16 MiB v7x, 32 MiB v5e/v6e
    limit_cap = min(max((cap * 3) // 5, 32 * 1024 * 1024), 64 * 1024 * 1024)
    return tile_budget, limit_cap


def _prep_target(targets, r0):
    """Pick the narrowest layout-safe dtype for the ground-truth stream."""
    if targets.dtype == jnp.bool_:
        if r0 % 32 == 0:
            return targets.astype(jnp.uint8), 32
        return targets.astype(jnp.float32), 8
    isz = jnp.dtype(targets.dtype).itemsize
    if isz == 4:
        return targets, 8
    if isz == 2 and r0 % 16 == 0:
        return targets, 16
    return targets.astype(jnp.float32), 8


def _plan_tiling(r0, m, src_isz, tgt_isz, gran, budget_bytes):
    """Returns (Rp, Rb, K, tgt_resident): padded (8,128)-row count, sublane
    tile rows, number of K steps, and whether the whole GT row is VMEM
    resident for the group (eliminating the S-fold re-fetch)."""
    rp = -(-r0 // gran) * gran
    tgt_row = 2 * rp * 128 * tgt_isz               # resident + double buffer
    resident = tgt_row <= budget_bytes // 3
    src_budget = budget_bytes - (tgt_row if resident else 0)
    per_row = 2 * 128 * (m * src_isz + (0 if resident else tgt_isz))
    cap = max(gran, (src_budget // max(per_row, 1)) // gran * gran)
    if cap >= rp:
        return rp, rp, 1, resident
    rb, cand = None, cap
    while cand >= gran:
        if rp % cand == 0:
            rb = cand
            break
        cand -= gran
    if rb is None or rb * 4 < cap:
        rb = cap                                   # pad instead of shrinking K
        rp = -(-rp // rb) * rb
    return rp, rb, rp // rb, resident


# ----------------------------------------------------------------------------
# Fused launch: one pallas_call covers every (frame, step, object) group
# ----------------------------------------------------------------------------
def fused_mask_losses_pallas(src_all, targets, num_objects,
                             focal_alpha, focal_gamma):
    """src_all [T,S,N,M,H,W] mask logits (native dtype), targets [T,N,H,W]
    -> (focal, dice, actual_iou), each [T,S,N,M] float32.  focal/dice are
    already normalised as in the PyTorch spec; actual_iou is the raw IoU."""
    T, S, N, M, H, W = src_all.shape
    HW = H * W
    r0 = -(-HW // 128)

    tgt, tgt_gran = _prep_target(targets, r0)
    src_isz = jnp.dtype(src_all.dtype).itemsize
    tgt_isz = jnp.dtype(tgt.dtype).itemsize
    gran = max(8, tgt_gran)

    tile_budget, limit_cap = _vmem_budget()
    rp, rb, K, resident = _plan_tiling(r0, M, src_isz, tgt_isz, gran,
                                       tile_budget)
    hw_pad = rp * 128

    src_flat = src_all.reshape(T, S, N, M, HW)
    tgt_flat = tgt.reshape(T, N, HW)
    if hw_pad != HW:
        src_flat = jnp.pad(src_flat, [(0, 0)] * 4 + [(0, hw_pad - HW)],
                           constant_values=_PAD_LOGIT)
        tgt_flat = jnp.pad(tgt_flat, [(0, 0), (0, 0), (0, hw_pad - HW)],
                           constant_values=0)
    src6 = src_flat.reshape(T, S, N, M, rp, 128)
    tgt4 = tgt_flat.reshape(T, N, rp, 128)

    need = 2 * M * rb * 128 * src_isz
    need += 2 * (rp if resident else rb) * 128 * tgt_isz
    need += (5 * M + 2) * 8 * 128 * 4 + 2 * M * 3 * 4
    vmem_limit = int(min(limit_cap,
                         max(32 * 1024 * 1024, need + 8 * 1024 * 1024)))

    kernel = functools.partial(
        _mask_losses_kernel,
        rb=rb, hw_total=float(HW), num_objects=float(num_objects),
        focal_alpha=float(focal_alpha), focal_gamma=float(focal_gamma),
        tgt_resident=resident)

    src_spec = pl.BlockSpec((1, 1, 1, M, rb, 128),
                            lambda t, n, s, k: (t, s, n, 0, k, 0))
    if resident:
        # Constant block index across (s, k): the GT row is fetched once per
        # (frame, object) and stays resident while all S steps reduce over it.
        tgt_spec = pl.BlockSpec((1, 1, rp, 128),
                                lambda t, n, s, k: (t, n, 0, 0))
    else:
        tgt_spec = pl.BlockSpec((1, 1, rb, 128),
                                lambda t, n, s, k: (t, n, k, 0))
    out_spec = pl.BlockSpec((1, 1, 1, M, 3),
                            lambda t, n, s, k: (t, n, s, 0, 0))

    out = pl.pallas_call(
        kernel,
        out_shape=jax.ShapeDtypeStruct((T, N, S, M, 3), jnp.float32),
        grid_spec=pltpu.PrefetchScalarGridSpec(
            num_scalar_prefetch=0,
            grid=(T, N, S, K),
            in_specs=[src_spec, tgt_spec],
            out_specs=out_spec,
            scratch_shapes=[pltpu.VMEM((M, 8, 128), jnp.float32)] * 5
                         + [pltpu.VMEM((8, 128), jnp.float32)] * 2,
        ),
        compiler_params=pltpu.CompilerParams(
            dimension_semantics=("parallel", "parallel", "parallel",
                                 "arbitrary"),
            vmem_limit_bytes=vmem_limit),
    )(src6, tgt4)

    out = out.transpose(0, 2, 1, 3, 4)            # (T, S, N, M, 3)
    return out[..., 0], out[..., 1], out[..., 2]


# ----------------------------------------------------------------------------
# Tiny plain-JAX helper for the object-score focal-loss path (N*1 elements)
# ----------------------------------------------------------------------------
def _focal_loss_dense(inputs, targets, alpha, gamma):
    prob = jax.nn.sigmoid(inputs)
    ce = (jnp.maximum(inputs, 0.0) - inputs * targets
          + jnp.log1p(jnp.exp(-jnp.abs(inputs))))
    p_t = prob * targets + (1.0 - prob) * (1.0 - targets)
    loss = ce * (1.0 - p_t) ** float(gamma)
    if alpha >= 0:
        alpha_t = alpha * targets + (1.0 - alpha) * (1.0 - targets)
        loss = alpha_t * loss
    return loss


# ----------------------------------------------------------------------------
# Module (stateless config; no learned parameters in the PyTorch original)
# ----------------------------------------------------------------------------
class MultiStepMultiMasksAndIous:
    def __init__(self, weight_dict, focal_alpha=0.25, focal_gamma=2,
                 supervise_all_iou=False, iou_use_l1_loss=False,
                 pred_obj_scores=False, focal_gamma_obj_score=0.0,
                 focal_alpha_obj_score=-1):
        self.weight_dict = weight_dict
        self.focal_alpha = focal_alpha
        self.focal_gamma = focal_gamma
        self.focal_alpha_obj_score = focal_alpha_obj_score
        self.focal_gamma_obj_score = focal_gamma_obj_score
        self.supervise_all_iou = supervise_all_iou
        self.iou_use_l1_loss = iou_use_l1_loss
        self.pred_obj_scores = pred_obj_scores

    def __call__(self, outs_batch, targets_batch):
        num_frames = len(outs_batch)
        assert num_frames == targets_batch.shape[0] and num_frames > 0
        if targets_batch.ndim != 4:
            # TODO(synk): grasp branch (_update_losses_grasp / 5-D targets) not implemented.
            raise NotImplementedError("grasp-style targets are not supported")
        # TODO(synk): torch.distributed all_reduce of num_objects omitted
        # (single-host / world_size == 1 semantics).
        num_objects = max(float(targets_batch.shape[1]), 1.0)

        # Batch every step of every frame into one slab -> one fused Pallas
        # launch (assumes consistent [N,M,H,W] shapes across steps).  Logits
        # cross the boundary in their native dtype (bf16 stays bf16).
        src_all = jnp.stack(
            [jnp.stack(o["multistep_pred_multimasks_high_res"]) for o in outs_batch])
        ious_all = jnp.stack(
            [jnp.stack(o["multistep_pred_ious"]) for o in outs_batch])
        obj_all = jnp.stack(
            [jnp.stack(o["multistep_object_score_logits"]) for o in outs_batch])
        T, S, N, M, H, W = src_all.shape
        assert ious_all.shape == (T, S, N, M)

        loss_multimask, loss_multidice, actual_ious = fused_mask_losses_pallas(
            src_all, targets_batch, num_objects,
            self.focal_alpha, self.focal_gamma)

        d = ious_all.astype(jnp.float32) - actual_ious
        loss_multiiou = (jnp.abs(d) if self.iou_use_l1_loss else d * d) / num_objects

        if not self.pred_obj_scores:
            loss_class_total = jnp.float32(0.0)
            target_obj = jnp.ones((T, 1, N, 1), jnp.float32)
        else:
            target_obj = jnp.any(targets_batch.reshape(T, N, -1) > 0,
                                 axis=-1).astype(jnp.float32)[:, None, :, None]
            fl = _focal_loss_dense(
                obj_all.astype(jnp.float32),
                jnp.broadcast_to(target_obj, obj_all.shape),
                self.focal_alpha_obj_score, self.focal_gamma_obj_score)
            loss_class_total = jnp.sum(jnp.mean(fl, axis=-1)) / num_objects

        if M > 1:
            combo = (loss_multimask * self.weight_dict["loss_mask"]
                     + loss_multidice * self.weight_dict["loss_dice"])
            best = jnp.argmin(combo, axis=-1)[..., None]           # [T,S,N,1]
            loss_mask = jnp.take_along_axis(loss_multimask, best, axis=-1)
            loss_dice = jnp.take_along_axis(loss_multidice, best, axis=-1)
            if self.supervise_all_iou:
                loss_iou = jnp.mean(loss_multiiou, axis=-1, keepdims=True)
            else:
                loss_iou = jnp.take_along_axis(loss_multiiou, best, axis=-1)
        else:
            loss_mask, loss_dice, loss_iou = (loss_multimask, loss_multidice,
                                              loss_multiiou)

        loss_mask = loss_mask * target_obj
        loss_dice = loss_dice * target_obj
        loss_iou = loss_iou * target_obj

        # Sum over steps/objects within a frame, then average over frames
        # (identical to the per-frame accumulation + /num_frames of the spec).
        losses = {
            "loss_mask": jnp.sum(loss_mask) / num_frames,
            "loss_dice": jnp.sum(loss_dice) / num_frames,
            "loss_iou": jnp.sum(loss_iou) / num_frames,
            "loss_class": loss_class_total / num_frames,
        }
        losses[CORE_LOSS_KEY] = self.reduce_loss(losses)
        return losses

    def reduce_loss(self, losses):
        reduced = 0.0
        for loss_key, weight in self.weight_dict.items():
            if loss_key not in losses:
                raise ValueError(f"{type(self)} doesn't compute {loss_key}")
            if weight != 0:
                reduced = reduced + losses[loss_key] * weight
        return reduced


# ----------------------------------------------------------------------------
# Pure-JAX reference (literal port of the PyTorch spec) for correctness checks
# ----------------------------------------------------------------------------
def _ref_sigmoid_focal_loss(inputs, targets, num_objects, alpha=0.25, gamma=2,
                            loss_on_multimask=False):
    prob = jax.nn.sigmoid(inputs)
    ce = (jnp.maximum(inputs, 0.0) - inputs * targets
          + jnp.log1p(jnp.exp(-jnp.abs(inputs))))
    p_t = prob * targets + (1 - prob) * (1 - targets)
    loss = ce * (1 - p_t) ** gamma
    if alpha >= 0:
        loss = (alpha * targets + (1 - alpha) * (1 - targets)) * loss
    if loss_on_multimask:
        return loss.reshape(loss.shape[0], loss.shape[1], -1).mean(-1) / num_objects
    return loss.mean(axis=1).sum() / num_objects


def _ref_dice_loss(inputs, targets, num_objects, loss_on_multimask=False):
    assert loss_on_multimask
    inputs = jax.nn.sigmoid(inputs)
    i2 = inputs.reshape(inputs.shape[0], inputs.shape[1], -1)
    t2 = targets.reshape(targets.shape[0], targets.shape[1], -1)
    numerator = 2 * (i2 * t2).sum(-1)
    denominator = i2.sum(-1) + t2.sum(-1)
    return (1 - (numerator + 1) / (denominator + 1)) / num_objects


def _ref_iou_loss(inputs, targets, pred_ious, num_objects, use_l1_loss=False):
    pred_mask = inputs.reshape(inputs.shape[0], inputs.shape[1], -1) > 0
    gt_mask = targets.reshape(targets.shape[0], targets.shape[1], -1) > 0
    area_i = jnp.sum(pred_mask & gt_mask, axis=-1).astype(jnp.float32)
    area_u = jnp.sum(pred_mask | gt_mask, axis=-1).astype(jnp.float32)
    actual_ious = area_i / jnp.maximum(area_u, 1.0)
    diff = pred_ious - actual_ious
    loss = jnp.abs(diff) if use_l1_loss else diff * diff
    return loss / num_objects


def _reference_losses(cfg, outs_batch, targets_batch):
    num_objects = max(float(targets_batch.shape[1]), 1.0)
    total = {"loss_mask": 0.0, "loss_dice": 0.0, "loss_iou": 0.0,
             "loss_class": 0.0, CORE_LOSS_KEY: 0.0}
    for outs, targets in zip(outs_batch, targets_batch):
        target_masks = targets[:, None].astype(jnp.float32)
        frame = {"loss_mask": 0.0, "loss_dice": 0.0, "loss_iou": 0.0,
                 "loss_class": 0.0}
        for src_masks, ious, obj_logits in zip(
                outs["multistep_pred_multimasks_high_res"],
                outs["multistep_pred_ious"],
                outs["multistep_object_score_logits"]):
            tm = jnp.broadcast_to(target_masks, src_masks.shape)
            lmm = _ref_sigmoid_focal_loss(src_masks, tm, num_objects,
                                          cfg.focal_alpha, cfg.focal_gamma, True)
            lmd = _ref_dice_loss(src_masks, tm, num_objects, True)
            lmi = _ref_iou_loss(src_masks, tm, ious, num_objects,
                                cfg.iou_use_l1_loss)
            if not cfg.pred_obj_scores:
                loss_class = jnp.float32(0.0)
                target_obj = jnp.ones((lmm.shape[0], 1), jnp.float32)
            else:
                target_obj = jnp.any(
                    (tm[:, 0] > 0).reshape(tm.shape[0], -1),
                    axis=-1)[..., None].astype(jnp.float32)
                loss_class = _ref_sigmoid_focal_loss(
                    obj_logits, target_obj, num_objects,
                    cfg.focal_alpha_obj_score, cfg.focal_gamma_obj_score, False)
            if lmm.shape[1] > 1:
                combo = (lmm * cfg.weight_dict["loss_mask"]
                         + lmd * cfg.weight_dict["loss_dice"])
                best = jnp.argmin(combo, axis=-1)
                bi = jnp.arange(combo.shape[0])
                loss_mask = lmm[bi, best][:, None]
                loss_dice = lmd[bi, best][:, None]
                if cfg.supervise_all_iou:
                    loss_iou = lmi.mean(axis=-1)[:, None]
                else:
                    loss_iou = lmi[bi, best][:, None]
            else:
                loss_mask, loss_dice, loss_iou = lmm, lmd, lmi
            frame["loss_mask"] += jnp.sum(loss_mask * target_obj)
            frame["loss_dice"] += jnp.sum(loss_dice * target_obj)
            frame["loss_iou"] += jnp.sum(loss_iou * target_obj)
            frame["loss_class"] += loss_class
        frame[CORE_LOSS_KEY] = sum(w * frame[k]
                                   for k, w in cfg.weight_dict.items() if w != 0)
        for k in total:
            total[k] = total[k] + frame[k]
    nf = len(outs_batch)
    return {k: v / nf for k, v in total.items()}


# ----------------------------------------------------------------------------
# Demo / correctness check
# ----------------------------------------------------------------------------
if __name__ == "__main__":
    key = jax.random.PRNGKey(0)
    T, S, N, M, H, W = 2, 2, 2, 3, 32, 32   # frames, steps, objects, masks, HxW

    k_t, key = jax.random.split(key)
    targets_batch = (jax.random.uniform(k_t, (T, N, H, W)) > 0.5).astype(jnp.float32)

    outs_batch = []
    for _ in range(T):
        masks_list, ious_list, obj_list = [], [], []
        for _ in range(S):
            k1, k2, k3, key = jax.random.split(key, 4)
            masks_list.append(jax.random.normal(k1, (N, M, H, W), jnp.float32) * 2.0)
            ious_list.append(jax.random.uniform(k2, (N, M), jnp.float32))
            obj_list.append(jax.random.normal(k3, (N, 1), jnp.float32))
        outs_batch.append({
            "multistep_pred_multimasks_high_res": masks_list,
            "multistep_pred_ious": ious_list,
            "multistep_object_score_logits": obj_list,
        })

    weight_dict = {"loss_mask": 20.0, "loss_dice": 1.0,
                   "loss_iou": 1.0, "loss_class": 1.0}

    # ---- direct check of the fused kernel against the pure-JAX reference ----
    num_objects = max(float(N), 1.0)
    src_all = jnp.stack([jnp.stack(o["multistep_pred_multimasks_high_res"])
                         for o in outs_batch])                    # [T,S,N,M,H,W]
    f_k, d_k, a_k = fused_mask_losses_pallas(src_all, targets_batch,
                                             num_objects, 0.25, 2)
    jax.block_until_ready(f_k)

    A = T * S * N
    src_flat = src_all.reshape(A, M, H, W).astype(jnp.float32)
    tgt_flat = jnp.broadcast_to(targets_batch[:, None, :, None],
                                src_all.shape).reshape(A, M, H, W).astype(jnp.float32)
    f_r = _ref_sigmoid_focal_loss(src_flat, tgt_flat, num_objects, 0.25, 2,
                                  True).reshape(T, S, N, M)
    d_r = _ref_dice_loss(src_flat, tgt_flat, num_objects, True).reshape(T, S, N, M)
    pm = src_flat.reshape(A, M, -1) > 0
    gm = tgt_flat.reshape(A, M, -1) > 0
    a_r = (jnp.sum(pm & gm, -1).astype(jnp.float32)
           / jnp.maximum(jnp.sum(pm | gm, -1).astype(jnp.float32), 1.0)
           ).reshape(T, S, N, M)
    assert jnp.allclose(f_k, f_r, rtol=2e-3, atol=1e-5)
    assert jnp.allclose(d_k, d_r, rtol=2e-3, atol=1e-5)
    assert jnp.allclose(a_k, a_r, rtol=2e-3, atol=1e-5)

    # ---- end-to-end module check (two configs) vs literal pure-JAX port ----
    configs = [
        dict(),
        dict(pred_obj_scores=True, supervise_all_iou=True, iou_use_l1_loss=True,
             focal_gamma_obj_score=2.0, focal_alpha_obj_score=0.25),
    ]
    for cfg_kwargs in configs:
        criterion = MultiStepMultiMasksAndIous(weight_dict, **cfg_kwargs)
        losses = criterion(outs_batch, targets_batch)
        jax.block_until_ready(losses[CORE_LOSS_KEY])
        ref = _reference_losses(criterion, outs_batch, targets_batch)
        for lk in ("loss_mask", "loss_dice", "loss_iou", "loss_class",
                   CORE_LOSS_KEY):
            assert jnp.allclose(losses[lk], ref[lk], rtol=2e-3, atol=1e-5), (
                lk, losses[lk], ref[lk])

    print("KERNEL_OK")
</pallas_src>

<mosaic_0001>
module attributes {stable_mosaic.version = 11 : i64} {
  func.func @_mask_losses_kernel(%arg0: i32, %arg1: i32, %arg2: i32, %arg3: i32, %arg4: memref<1x1x1x3x8x128xf32, #tpu.memory_space<vmem>>, %arg5: memref<1x1x8x128xf32, #tpu.memory_space<vmem>>, %arg6: memref<1x1x1x3x3xf32, #tpu.memory_space<vmem>>, %arg7: memref<3x8x128xf32, #tpu.memory_space<vmem>>, %arg8: memref<3x8x128xf32, #tpu.memory_space<vmem>>, %arg9: memref<3x8x128xf32, #tpu.memory_space<vmem>>, %arg10: memref<3x8x128xf32, #tpu.memory_space<vmem>>, %arg11: memref<3x8x128xf32, #tpu.memory_space<vmem>>, %arg12: memref<8x128xf32, #tpu.memory_space<vmem>>, %arg13: memref<8x128xf32, #tpu.memory_space<vmem>>) attributes {dimension_semantics = [#tpu.dimension_semantics<parallel>, #tpu.dimension_semantics<parallel>, #tpu.dimension_semantics<parallel>, #tpu.dimension_semantics<arbitrary>], iteration_bounds = array<i64: 2, 2, 2, 1>, scalar_prefetch = 0 : i64, scratch_operands = 7 : i64, tpu.core_type = #tpu.core_type<tc>, window_params = [{transform_indices = @transform_0, window_bounds = array<i64: 1, 1, 1, 3, 8, 128>}, {transform_indices = @transform_1, window_bounds = array<i64: 1, 1, 8, 128>}, {transform_indices = @transform_2, window_bounds = array<i64: 1, 1, 1, 3, 3>}]} {
    %c0_i32 = arith.constant 0 : i32
    %0 = arith.cmpi eq, %arg3, %c0_i32 : i32
    %1 = arith.extui %0 : i1 to i32
    %c0_i32_0 = arith.constant 0 : i32
    %2 = arith.cmpi ne, %1, %c0_i32_0 : i32
    scf.if %2 {
      %cst_66 = arith.constant 0.000000e+00 : f32
      %98 = vector.broadcast %cst_66 : f32 to vector<3x8x128xf32>
      %c0_67 = arith.constant 0 : index
      %c0_68 = arith.constant 0 : index
      %c0_69 = arith.constant 0 : index
      %99 = vector.load %arg7[%c0_67, %c0_68, %c0_69] : memref<3x8x128xf32, #tpu.memory_space<vmem>>, vector<3x8x128xf32>
      tpu.vector_store %arg7[%c0_67, %c0_68, %c0_69], %98 {strides = array<i32>} : memref<3x8x128xf32, #tpu.memory_space<vmem>>, vector<3x8x128xf32>,
      %cst_70 = arith.constant 0.000000e+00 : f32
      %100 = vector.broadcast %cst_70 : f32 to vector<3x8x128xf32>
      %c0_71 = arith.constant 0 : index
      %c0_72 = arith.constant 0 : index
      %c0_73 = arith.constant 0 : index
      %101 = vector.load %arg8[%c0_71, %c0_72, %c0_73] : memref<3x8x128xf32, #tpu.memory_space<vmem>>, vector<3x8x128xf32>
      tpu.vector_store %arg8[%c0_71, %c0_72, %c0_73], %100 {strides = array<i32>} : memref<3x8x128xf32, #tpu.memory_space<vmem>>, vector<3x8x128xf32>,
      %cst_74 = arith.constant 0.000000e+00 : f32
      %102 = vector.broadcast %cst_74 : f32 to vector<3x8x128xf32>
      %c0_75 = arith.constant 0 : index
      %c0_76 = arith.constant 0 : index
      %c0_77 = arith.constant 0 : index
      %103 = vector.load %arg9[%c0_75, %c0_76, %c0_77] : memref<3x8x128xf32, #tpu.memory_space<vmem>>, vector<3x8x128xf32>
      tpu.vector_store %arg9[%c0_75, %c0_76, %c0_77], %102 {strides = array<i32>} : memref<3x8x128xf32, #tpu.memory_space<vmem>>, vector<3x8x128xf32>,
      %cst_78 = arith.constant 0.000000e+00 : f32
      %104 = vector.broadcast %cst_78 : f32 to vector<3x8x128xf32>
      %c0_79 = arith.constant 0 : index
      %c0_80 = arith.constant 0 : index
      %c0_81 = arith.constant 0 : index
      %105 = vector.load %arg10[%c0_79, %c0_80, %c0_81] : memref<3x8x128xf32, #tpu.memory_space<vmem>>, vector<3x8x128xf32>
      tpu.vector_store %arg10[%c0_79, %c0_80, %c0_81], %104 {strides = array<i32>} : memref<3x8x128xf32, #tpu.memory_space<vmem>>, vector<3x8x128xf32>,
      %cst_82 = arith.constant 0.000000e+00 : f32
      %106 = vector.broadcast %cst_82 : f32 to vector<3x8x128xf32>
      %c0_83 = arith.constant 0 : index
      %c0_84 = arith.constant 0 : index
      %c0_85 = arith.constant 0 : index
      %107 = vector.load %arg11[%c0_83, %c0_84, %c0_85] : memref<3x8x128xf32, #tpu.memory_space<vmem>>, vector<3x8x128xf32>
      tpu.vector_store %arg11[%c0_83, %c0_84, %c0_85], %106 {strides = array<i32>} : memref<3x8x128xf32, #tpu.memory_space<vmem>>, vector<3x8x128xf32>,
      %cst_86 = arith.constant 0.000000e+00 : f32
      %108 = vector.broadcast %cst_86 : f32 to vector<8x128xf32>
      %c0_87 = arith.constant 0 : index
      %c0_88 = arith.constant 0 : index
      %109 = vector.load %arg12[%c0_87, %c0_88] : memref<8x128xf32, #tpu.memory_space<vmem>>, vector<8x128xf32>
      tpu.vector_store %arg12[%c0_87, %c0_88], %108 {strides = array<i32>} : memref<8x128xf32, #tpu.memory_space<vmem>>, vector<8x128xf32>,
      %cst_89 = arith.constant 0.000000e+00 : f32
      %110 = vector.broadcast %cst_89 : f32 to vector<8x128xf32>
      %c0_90 = arith.constant 0 : index
      %c0_91 = arith.constant 0 : index
      %111 = vector.load %arg13[%c0_90, %c0_91] : memref<8x128xf32, #tpu.memory_space<vmem>>, vector<8x128xf32>
      tpu.vector_store %arg13[%c0_90, %c0_91], %110 {strides = array<i32>} : memref<8x128xf32, #tpu.memory_space<vmem>>, vector<8x128xf32>,
    } else {
    }
    %c0 = arith.constant 0 : index
    %c0_1 = arith.constant 0 : index
    %c0_2 = arith.constant 0 : index
    %c0_3 = arith.constant 0 : index
    %c0_4 = arith.constant 0 : index
    %c0_5 = arith.constant 0 : index
    %3 = vector.load %arg4[%c0, %c0_1, %c0_2, %c0_3, %c0_4, %c0_5] : memref<1x1x1x3x8x128xf32, #tpu.memory_space<vmem>>, vector<1x1x1x3x8x128xf32>
    %4 = vector.shape_cast %3 : vector<1x1x1x3x8x128xf32> to vector<3x8x128xf32>
    %c8_i32 = arith.constant 8 : i32
    %5 = arith.muli %arg3, %c8_i32 : i32
    %6 = tpu.assume_multiple %5, 8 : i32
    %c0_6 = arith.constant 0 : index
    %c0_7 = arith.constant 0 : index
    %7 = arith.index_cast %6 : i32 to index
    %c0_8 = arith.constant 0 : index
    %8 = vector.load %arg5[%c0_6, %c0_7, %7, %c0_8] : memref<1x1x8x128xf32, #tpu.memory_space<vmem>>, vector<1x1x8x128xf32>
    %9 = vector.shape_cast %8 : vector<1x1x8x128xf32> to vector<8x128xf32>
    %cst = arith.constant 0.000000e+00 : f32
    %10 = vector.broadcast %cst : f32 to vector<8x128xf32>
    %11 = arith.cmpf ogt, %9, %10 : vector<8x128xf32>
    %12 = arith.extui %11 : vector<8x128xi1> to vector<8x128xi32>
    %13 = arith.sitofp %12 : vector<8x128xi32> to vector<8x128xf32>
    %cst_9 = arith.constant -5.000000e-01 : f32
    %14 = vector.broadcast %cst_9 : f32 to vector<8x128xf32>
    %15 = arith.mulf %14, %9 : vector<8x128xf32>
    %cst_10 = arith.constant 7.500000e-01 : f32
    %16 = vector.broadcast %cst_10 : f32 to vector<8x128xf32>
    %17 = arith.addf %16, %15 : vector<8x128xf32>
    %18 = math.absf %4 : vector<3x8x128xf32>
    %cst_11 = arith.constant 0.000000e+00 : f32
    %19 = vector.broadcast %cst_11 : f32 to vector<3x8x128xf32>
    %20 = arith.subf %19, %18 : vector<3x8x128xf32>
    %21 = math.exp %20 : vector<3x8x128xf32>
    %cst_12 = arith.constant 1.000000e+00 : f32
    %22 = vector.broadcast %cst_12 : f32 to vector<3x8x128xf32>
    %23 = arith.addf %22, %21 : vector<3x8x128xf32>
    %cst_13 = arith.constant 1.000000e+00 : f32
    %24 = vector.broadcast %cst_13 : f32 to vector<3x8x128xf32>
    %25 = arith.divf %24, %23 : vector<3x8x128xf32>
    %cst_14 = arith.constant 0.000000e+00 : f32
    %26 = vector.broadcast %cst_14 : f32 to vector<3x8x128xf32>
    %27 = arith.cmpf oge, %4, %26 : vector<3x8x128xf32>
    %cst_15 = arith.constant 1.000000e+00 : f32
    %28 = vector.broadcast %cst_15 : f32 to vector<3x8x128xf32>
    %29 = arith.subf %28, %25 : vector<3x8x128xf32>
    %30 = arith.select %27, %25, %29 : vector<3x8x128xi1>, vector<3x8x128xf32>
    %cst_16 = arith.constant 0.000000e+00 : f32
    %31 = vector.broadcast %cst_16 : f32 to vector<3x8x128xf32>
    %32 = arith.maximumf %4, %31 : vector<3x8x128xf32>
    %33 = vector.shape_cast %9 : vector<8x128xf32> to vector<1x8x128xf32>
    %34 = vector.broadcast %33 : vector<1x8x128xf32> to vector<3x8x128xf32>
    %35 = arith.mulf %4, %34 : vector<3x8x128xf32>
    %36 = arith.subf %32, %35 : vector<3x8x128xf32>
    %37 = math.log1p %21 : vector<3x8x128xf32>
    %38 = arith.addf %36, %37 : vector<3x8x128xf32>
    %39 = vector.shape_cast %9 : vector<8x128xf32> to vector<1x8x128xf32>
    %40 = vector.broadcast %39 : vector<1x8x128xf32> to vector<3x8x128xf32>
    %41 = arith.mulf %30, %40 : vector<3x8x128xf32>
    %42 = vector.shape_cast %9 : vector<8x128xf32> to vector<1x8x128xf32>
    %43 = vector.broadcast %42 : vector<1x8x128xf32> to vector<3x8x128xf32>
    %44 = arith.addf %30, %43 : vector<3x8x128xf32>
    %cst_17 = arith.constant 2.000000e+00 : f32
    %45 = vector.broadcast %cst_17 : f32 to vector<3x8x128xf32>
    %46 = arith.mulf %45, %41 : vector<3x8x128xf32>
    %47 = arith.subf %44, %46 : vector<3x8x128xf32>
    %48 = arith.mulf %47, %47 : vector<3x8x128xf32>
    %49 = arith.mulf %38, %48 : vector<3x8x128xf32>
    %50 = vector.shape_cast %17 : vector<8x128xf32> to vector<1x8x128xf32>
    %51 = vector.broadcast %50 : vector<1x8x128xf32> to vector<3x8x128xf32>
    %52 = arith.mulf %49, %51 : vector<3x8x128xf32>
    %cst_18 = arith.constant 0.000000e+00 : f32
    %53 = vector.broadcast %cst_18 : f32 to vector<3x8x128xf32>
    %54 = arith.cmpf ogt, %4, %53 : vector<3x8x128xf32>
    %55 = arith.extui %54 : vector<3x8x128xi1> to vector<3x8x128xi32>
    %56 = arith.sitofp %55 : vector<3x8x128xi32> to vector<3x8x128xf32>
    %57 = vector.shape_cast %13 : vector<8x128xf32> to vector<1x8x128xf32>
    %58 = vector.broadcast %57 : vector<1x8x128xf32> to vector<3x8x128xf32>
    %59 = arith.mulf %56, %58 : vector<3x8x128xf32>
    %c0_19 = arith.constant 0 : index
    %c0_20 = arith.constant 0 : index
    %c0_21 = arith.constant 0 : index
    %60 = vector.load %arg7[%c0_19, %c0_20, %c0_21] : memref<3x8x128xf32, #tpu.memory_space<vmem>>, vector<3x8x128xf32>
    %61 = vector.shape_cast %52 : vector<3x8x128xf32> to vector<3x1x8x128xf32>
    %cst_22 = arith.constant dense<0.000000e+00> : vector<3x8x128xf32>
    %62 = vector.multi_reduction <add>, %61, %cst_22 [1] : vector<3x1x8x128xf32> to vector<3x8x128xf32>
    %63 = arith.addf %60, %62 : vector<3x8x128xf32>
    %c0_23 = arith.constant 0 : index
    %c0_24 = arith.constant 0 : index
    %c0_25 = arith.constant 0 : index
    %64 = vector.load %arg7[%c0_23, %c0_24, %c0_25] : memref<3x8x128xf32, #tpu.memory_space<vmem>>, vector<3x8x128xf32>
    tpu.vector_store %arg7[%c0_23, %c0_24, %c0_25], %63 {strides = array<i32>} : memref<3x8x128xf32, #tpu.memory_space<vmem>>, vector<3x8x128xf32>,
    %c0_26 = arith.constant 0 : index
    %c0_27 = arith.constant 0 : index
    %c0_28 = arith.constant 0 : index
    %65 = vector.load %arg8[%c0_26, %c0_27, %c0_28] : memref<3x8x128xf32, #tpu.memory_space<vmem>>, vector<3x8x128xf32>
    %66 = vector.shape_cast %30 : vector<3x8x128xf32> to vector<3x1x8x128xf32>
    %cst_29 = arith.constant dense<0.000000e+00> : vector<3x8x128xf32>
    %67 = vector.multi_reduction <add>, %66, %cst_29 [1] : vector<3x1x8x128xf32> to vector<3x8x128xf32>
    %68 = arith.addf %65, %67 : vector<3x8x128xf32>
    %c0_30 = arith.constant 0 : index
    %c0_31 = arith.constant 0 : index
    %c0_32 = arith.constant 0 : index
    %69 = vector.load %arg8[%c0_30, %c0_31, %c0_32] : memref<3x8x128xf32, #tpu.memory_space<vmem>>, vector<3x8x128xf32>
    tpu.vector_store %arg8[%c0_30, %c0_31, %c0_32], %68 {strides = array<i32>} : memref<3x8x128xf32, #tpu.memory_space<vmem>>, vector<3x8x128xf32>,
    %c0_33 = arith.constant 0 : index
    %c0_34 = arith.constant 0 : index
    %c0_35 = arith.constant 0 : index
    %70 = vector.load %arg9[%c0_33, %c0_34, %c0_35] : memref<3x8x128xf32, #tpu.memory_space<vmem>>, vector<3x8x128xf32>
    %71 = vector.shape_cast %41 : vector<3x8x128xf32> to vector<3x1x8x128xf32>
    %cst_36 = arith.constant dense<0.000000e+00> : vector<3x8x128xf32>
    %72 = vector.multi_reduction <add>, %71, %cst_36 [1] : vector<3x1x8x128xf32> to vector<3x8x128xf32>
    %73 = arith.addf %70, %72 : vector<3x8x128xf32>
    %c0_37 = arith.constant 0 : index
    %c0_38 = arith.constant 0 : index
    %c0_39 = arith.constant 0 : index
    %74 = vector.load %arg9[%c0_37, %c0_38, %c0_39] : memref<3x8x128xf32, #tpu.memory_space<vmem>>, vector<3x8x128xf32>
    tpu.vector_store %arg9[%c0_37, %c0_38, %c0_39], %73 {strides = array<i32>} : memref<3x8x128xf32, #tpu.memory_space<vmem>>, vector<3x8x128xf32>,
    %c0_40 = arith.constant 0 : index
    %c0_41 = arith.constant 0 : index
    %c0_42 = arith.constant 0 : index
    %75 = vector.load %arg10[%c0_40, %c0_41, %c0_42] : memref<3x8x128xf32, #tpu.memory_space<vmem>>, vector<3x8x128xf32>
    %76 = vector.shape_cast %56 : vector<3x8x128xf32> to vector<3x1x8x128xf32>
    %cst_43 = arith.constant dense<0.000000e+00> : vector<3x8x128xf32>
    %77 = vector.multi_reduction <add>, %76, %cst_43 [1] : vector<3x1x8x128xf32> to vector<3x8x128xf32>
    %78 = arith.addf %75, %77 : vector<3x8x128xf32>
    %c0_44 = arith.constant 0 : index
    %c0_45 = arith.constant 0 : index
    %c0_46 = arith.constant 0 : index
    %79 = vector.load %arg10[%c0_44, %c0_45, %c0_46] : memref<3x8x128xf32, #tpu.memory_space<vmem>>, vector<3x8x128xf32>
    tpu.vector_store %arg10[%c0_44, %c0_45, %c0_46], %78 {strides = array<i32>} : memref<3x8x128xf32, #tpu.memory_space<vmem>>, vector<3x8x128xf32>,
    %c0_47 = arith.constant 0 : index
    %c0_48 = arith.constant 0 : index
    %c0_49 = arith.constant 0 : index
    %80 = vector.load %arg11[%c0_47, %c0_48, %c0_49] : memref<3x8x128xf32, #tpu.memory_space<vmem>>, vector<3x8x128xf32>
    %81 = vector.shape_cast %59 : vector<3x8x128xf32> to vector<3x1x8x128xf32>
    %cst_50 = arith.constant dense<0.000000e+00> : vector<3x8x128xf32>
    %82 = vector.multi_reduction <add>, %81, %cst_50 [1] : vector<3x1x8x128xf32> to vector<3x8x128xf32>
    %83 = arith.addf %80, %82 : vector<3x8x128xf32>
    %c0_51 = arith.constant 0 : index
    %c0_52 = arith.constant 0 : index
    %c0_53 = arith.constant 0 : index
    %84 = vector.load %arg11[%c0_51, %c0_52, %c0_53] : memref<3x8x128xf32, #tpu.memory_space<vmem>>, vector<3x8x128xf32>
    tpu.vector_store %arg11[%c0_51, %c0_52, %c0_53], %83 {strides = array<i32>} : memref<3x8x128xf32, #tpu.memory_space<vmem>>, vector<3x8x128xf32>,
    %c0_54 = arith.constant 0 : index
    %c0_55 = arith.constant 0 : index
    %85 = vector.load %arg12[%c0_54, %c0_55] : memref<8x128xf32, #tpu.memory_space<vmem>>, vector<8x128xf32>
    %86 = vector.shape_cast %9 : vector<8x128xf32> to vector<1x8x128xf32>
    %cst_56 = arith.constant dense<0.000000e+00> : vector<8x128xf32>
    %87 = vector.multi_reduction <add>, %86, %cst_56 [0] : vector<1x8x128xf32> to vector<8x128xf32>
    %88 = arith.addf %85, %87 : vector<8x128xf32>
    %c0_57 = arith.constant 0 : index
    %c0_58 = arith.constant 0 : index
    %89 = vector.load %arg12[%c0_57, %c0_58] : memref<8x128xf32, #tpu.memory_space<vmem>>, vector<8x128xf32>
    tpu.vector_store %arg12[%c0_57, %c0_58], %88 {strides = array<i32>} : memref<8x128xf32, #tpu.memory_space<vmem>>, vector<8x128xf32>,
    %c0_59 = arith.constant 0 : index
    %c0_60 = arith.constant 0 : index
    %90 = vector.load %arg13[%c0_59, %c0_60] : memref<8x128xf32, #tpu.memory_space<vmem>>, vector<8x128xf32>
    %91 = vector.shape_cast %13 : vector<8x128xf32> to vector<1x8x128xf32>
    %cst_61 = arith.constant dense<0.000000e+00> : vector<8x128xf32>
    %92 = vector.multi_reduction <add>, %91, %cst_61 [0] : vector<1x8x128xf32> to vector<8x128xf32>
    %93 = arith.addf %90, %92 : vector<8x128xf32>
    %c0_62 = arith.constant 0 : index
    %c0_63 = arith.constant 0 : index
    %94 = vector.load %arg13[%c0_62, %c0_63] : memref<8x128xf32, #tpu.memory_space<vmem>>, vector<8x128xf32>
    tpu.vector_store %arg13[%c0_62, %c0_63], %93 {strides = array<i32>} : memref<8x128xf32, #tpu.memory_space<vmem>>, vector<8x128xf32>,
    %c0_i32_64 = arith.constant 0 : i32
    %95 = arith.cmpi eq, %arg3, %c0_i32_64 : i32
    %96 = arith.extui %95 : i1 to i32
    %c0_i32_65 = arith.constant 0 : i32
    %97 = arith.cmpi ne, %96, %c0_i32_65 : i32
    scf.if %97 {
      %c0_66 = arith.constant 0 : index
      %c0_67 = arith.constant 0 : index
      %c0_68 = arith.constant 0 : index
      %98 = vector.load %arg7[%c0_66, %c0_67, %c0_68] : memref<3x8x128xf32, #tpu.memory_space<vmem>>, vector<3x8x128xf32>
      %cst_69 = arith.constant dense<0.000000e+00> : vector<3x8xf32>
      %99 = vector.multi_reduction <add>, %98, %cst_69 [2] : vector<3x8x128xf32> to vector<3x8xf32>
      %100 = vector.shape_cast %99 : vector<3x8xf32> to vector<3x8x1xf32>
      %cst_70 = arith.constant dense<0.000000e+00> : vector<3x1xf32>
      %101 = vector.multi_reduction <add>, %100, %cst_70 [1] : vector<3x8x1xf32> to vector<3x1xf32>
      %c0_71 = arith.constant 0 : index
      %c0_72 = arith.constant 0 : index
      %c0_73 = arith.constant 0 : index
      %102 = vector.load %arg8[%c0_71, %c0_72, %c0_73] : memref<3x8x128xf32, #tpu.memory_space<vmem>>, vector<3x8x128xf32>
      %cst_74 = arith.constant dense<0.000000e+00> : vector<3x8xf32>
      %103 = vector.multi_reduction <add>, %102, %cst_74 [2] : vector<3x8x128xf32> to vector<3x8xf32>
      %104 = vector.shape_cast %103 : vector<3x8xf32> to vector<3x8x1xf32>
      %cst_75 = arith.constant dense<0.000000e+00> : vector<3x1xf32>
      %105 = vector.multi_reduction <add>, %104, %cst_75 [1] : vector<3x8x1xf32> to vector<3x1xf32>
      %c0_76 = arith.constant 0 : index
      %c0_77 = arith.constant 0 : index
      %c0_78 = arith.constant 0 : index
      %106 = vector.load %arg9[%c0_76, %c0_77, %c0_78] : memref<3x8x128xf32, #tpu.memory_space<vmem>>, vector<3x8x128xf32>
      %cst_79 = arith.constant dense<0.000000e+00> : vector<3x8xf32>
      %107 = vector.multi_reduction <add>, %106, %cst_79 [2] : vector<3x8x128xf32> to vector<3x8xf32>
      %108 = vector.shape_cast %107 : vector<3x8xf32> to vector<3x8x1xf32>
      %cst_80 = arith.constant dense<0.000000e+00> : vector<3x1xf32>
      %109 = vector.multi_reduction <add>, %108, %cst_80 [1] : vector<3x8x1xf32> to vector<3x1xf32>
      %c0_81 = arith.constant 0 : index
      %c0_82 = arith.constant 0 : index
      %c0_83 = arith.constant 0 : index
      %110 = vector.load %arg10[%c0_81, %c0_82, %c0_83] : memref<3x8x128xf32, #tpu.memory_space<vmem>>, vector<3x8x128xf32>
      %cst_84 = arith.constant dense<0.000000e+00> : vector<3x8xf32>
      %111 = vector.multi_reduction <add>, %110, %cst_84 [2] : vector<3x8x128xf32> to vector<3x8xf32>
      %112 = vector.shape_cast %111 : vector<3x8xf32> to vector<3x8x1xf32>
      %cst_85 = arith.constant dense<0.000000e+00> : vector<3x1xf32>
      %113 = vector.multi_reduction <add>, %112, %cst_85 [1] : vector<3x8x1xf32> to vector<3x1xf32>
      %c0_86 = arith.constant 0 : index
      %c0_87 = arith.constant 0 : index
      %c0_88 = arith.constant 0 : index
      %114 = vector.load %arg11[%c0_86, %c0_87, %c0_88] : memref<3x8x128xf32, #tpu.memory_space<vmem>>, vector<3x8x128xf32>
      %cst_89 = arith.constant dense<0.000000e+00> : vector<3x8xf32>
      %115 = vector.multi_reduction <add>, %114, %cst_89 [2] : vector<3x8x128xf32> to vector<3x8xf32>
      %116 = vector.shape_cast %115 : vector<3x8xf32> to vector<3x8x1xf32>
      %cst_90 = arith.constant dense<0.000000e+00> : vector<3x1xf32>
      %117 = vector.multi_reduction <add>, %116, %cst_90 [1] : vector<3x8x1xf32> to vector<3x1xf32>
      %c0_91 = arith.constant 0 : index
      %c0_92 = arith.constant 0 : index
      %118 = vector.load %arg12[%c0_91, %c0_92] : memref<8x128xf32, #tpu.memory_space<vmem>>, vector<8x128xf32>
      %cst_93 = arith.constant dense<0.000000e+00> : vector<8xf32>
      %119 = vector.multi_reduction <add>, %118, %cst_93 [1] : vector<8x128xf32> to vector<8xf32>
      %120 = vector.shape_cast %119 : vector<8xf32> to vector<8x1xf32>
      %cst_94 = arith.constant dense<0.000000e+00> : vector<1xf32>
      %121 = vector.multi_reduction <add>, %120, %cst_94 [0] : vector<8x1xf32> to vector<1xf32>
      %122 = vector.shape_cast %121 : vector<1xf32> to vector<1x1xf32>
      %c0_95 = arith.constant 0 : index
      %c0_96 = arith.constant 0 : index
      %123 = vector.load %arg13[%c0_95, %c0_96] : memref<8x128xf32, #tpu.memory_space<vmem>>, vector<8x128xf32>
      %cst_97 = arith.constant dense<0.000000e+00> : vector<8xf32>
      %124 = vector.multi_reduction <add>, %123, %cst_97 [1] : vector<8x128xf32> to vector<8xf32>
      %125 = vector.shape_cast %124 : vector<8xf32> to vector<8x1xf32>
      %cst_98 = arith.constant dense<0.000000e+00> : vector<1xf32>
      %126 = vector.multi_reduction <add>, %125, %cst_98 [0] : vector<8x1xf32> to vector<1xf32>
      %127 = vector.shape_cast %126 : vector<1xf32> to vector<1x1xf32>
      %cst_99 = arith.constant 4.8828125E-4 : f32
      %128 = vector.broadcast %cst_99 : f32 to vector<3x1xf32>
      %129 = arith.mulf %101, %128 : vector<3x1xf32>
      %cst_100 = arith.constant 2.000000e+00 : f32
      %130 = vector.broadcast %cst_100 : f32 to vector<3x1xf32>
      %131 = arith.mulf %130, %109 : vector<3x1xf32>
      %cst_101 = arith.constant 1.000000e+00 : f32
      %132 = vector.broadcast %cst_101 : f32 to vector<3x1xf32>
      %133 = arith.addf %131, %132 : vector<3x1xf32>
      %134 = vector.broadcast %122 : vector<1x1xf32> to vector<3x1xf32>
      %135 = arith.addf %105, %134 : vector<3x1xf32>
      %cst_102 = arith.constant 1.000000e+00 : f32
      %136 = vector.broadcast %cst_102 : f32 to vector<3x1xf32>
      %137 = arith.addf %135, %136 : vector<3x1xf32>
      %138 = arith.divf %133, %137 : vector<3x1xf32>
      %cst_103 = arith.constant 1.000000e+00 : f32
      %139 = vector.broadcast %cst_103 : f32 to vector<3x1xf32>
      %140 = arith.subf %139, %138 : vector<3x1xf32>
      %cst_104 = arith.constant 5.000000e-01 : f32
      %141 = vector.broadcast %cst_104 : f32 to vector<3x1xf32>
      %142 = arith.mulf %140, %141 : vector<3x1xf32>
      %143 = vector.broadcast %127 : vector<1x1xf32> to vector<3x1xf32>
      %144 = arith.addf %113, %143 : vector<3x1xf32>
      %145 = arith.subf %144, %117 : vector<3x1xf32>
      %cst_105 = arith.constant 1.000000e+00 : f32
      %146 = vector.broadcast %cst_105 : f32 to vector<3x1xf32>
      %147 = arith.maximumf %145, %146 : vector<3x1xf32>
      %148 = arith.divf %117, %147 : vector<3x1xf32>
      %c0_106 = arith.constant 0 : index
      %c0_107 = arith.constant 0 : index
      %c0_108 = arith.constant 0 : index
      %c0_109 = arith.constant 0 : index
      %c0_110 = arith.constant 0 : index
      %149 = vector.load %arg6[%c0_106, %c0_107, %c0_108, %c0_109, %c0_110] : memref<1x1x1x3x3xf32, #tpu.memory_space<vmem>>, vector<1x1x1x3x1xf32>
      %150 = vector.shape_cast %149 : vector<1x1x1x3x1xf32> to vector<3x1xf32>
      %151 = vector.shape_cast %129 : vector<3x1xf32> to vector<1x1x1x3x1xf32>
      tpu.vector_store %arg6[%c0_106, %c0_107, %c0_108, %c0_109, %c0_110], %151 {strides = array<i32>} : memref<1x1x1x3x3xf32, #tpu.memory_space<vmem>>, vector<1x1x1x3x1xf32>,
      %c0_111 = arith.constant 0 : index
      %c0_112 = arith.constant 0 : index
      %c0_113 = arith.constant 0 : index
      %c0_114 = arith.constant 0 : index
      %c1 = arith.constant 1 : index
      %152 = vector.load %arg6[%c0_111, %c0_112, %c0_113, %c0_114, %c1] : memref<1x1x1x3x3xf32, #tpu.memory_space<vmem>>, vector<1x1x1x3x1xf32>
      %153 = vector.shape_cast %152 : vector<1x1x1x3x1xf32> to vector<3x1xf32>
      %154 = vector.shape_cast %142 : vector<3x1xf32> to vector<1x1x1x3x1xf32>
      tpu.vector_store %arg6[%c0_111, %c0_112, %c0_113, %c0_114, %c1], %154 {strides = array<i32>} : memref<1x1x1x3x3xf32, #tpu.memory_space<vmem>>, vector<1x1x1x3x1xf32>,
      %c0_115 = arith.constant 0 : index
      %c0_116 = arith.constant 0 : index
      %c0_117 = arith.constant 0 : index
      %c0_118 = arith.constant 0 : index
      %c2 = arith.constant 2 : index
      %155 = vector.load %arg6[%c0_115, %c0_116, %c0_117, %c0_118, %c2] : memref<1x1x1x3x3xf32, #tpu.memory_space<vmem>>, vector<1x1x1x3x1xf32>
      %156 = vector.shape_cast %155 : vector<1x1x1x3x1xf32> to vector<3x1xf32>
      %157 = vector.shape_cast %148 : vector<3x1xf32> to vector<1x1x1x3x1xf32>
      tpu.vector_store %arg6[%c0_115, %c0_116, %c0_117, %c0_118, %c2], %157 {strides = array<i32>} : memref<1x1x1x3x3xf32, #tpu.memory_space<vmem>>, vector<1x1x1x3x1xf32>,
    } else {
    }
    return
  }
  func.func @transform_0(%arg0: i32, %arg1: i32, %arg2: i32, %arg3: i32) -> (i32, i32, i32, i32, i32, i32) {
    %c0_i32 = arith.constant 0 : i32
    %c0_i32_0 = arith.constant 0 : i32
    %c0_i32_1 = arith.constant 0 : i32
    return %arg0, %arg2, %arg1, %c0_i32, %arg3, %c0_i32_0 : i32, i32, i32, i32, i32, i32
  }
  func.func @transform_1(%arg0: i32, %arg1: i32, %arg2: i32, %arg3: i32) -> (i32, i32, i32, i32) {
    %c0_i32 = arith.constant 0 : i32
    %c0_i32_0 = arith.constant 0 : i32
    %c0_i32_1 = arith.constant 0 : i32
    return %arg0, %arg1, %c0_i32, %c0_i32_0 : i32, i32, i32, i32
  }
  func.func @transform_2(%arg0: i32, %arg1: i32, %arg2: i32, %arg3: i32) -> (i32, i32, i32, i32, i32) {
    %c0_i32 = arith.constant 0 : i32
    %c0_i32_0 = arith.constant 0 : i32
    %c0_i32_1 = arith.constant 0 : i32
    return %arg0, %arg1, %arg2, %c0_i32, %c0_i32_0 : i32, i32, i32, i32, i32
  }
}

</mosaic_0001>

<bundles_post_ra>
// kernel: tpu_custom_call.1
= control target key start
LH: loop header
LB: loop body
LE: loop exit
PB: predicated region body
PF: predicated region fallthrough
CT: control target
= control target key end

     0   :  { %s1597_s0 = inlined_call_operand.hbm [shape: f32[2,2,2,3,8,128], index: 0, kind: input, shape index: {}]   ;;  %s1598_s1 = inlined_call_operand.hbm [shape: f32[2,2,8,128], index: 1, kind: input, shape index: {}]   ;;  %s1599_s2 = inlined_call_operand.vmem [shape: f32[2,2,2,3,3], index: 2, kind: output, shape index: {}]  }
   0x1   :  { %1612 = sst [smem:[#allocation22_spill]] %s1598_s1 }
   0x2   :  { %1613 = sst [smem:[#allocation23_spill]] %s1599_s2 }
   0x3   :  { %7 = vsyncpa [#allocation10], 0 }
   0x4   :  { %9 = vsyncpa [#allocation10 + $0x1], 0 }
   0x5   :  { %10 = vsyncpa [#allocation12], 0 }
   0x6   :  { %12 = vsyncpa [#allocation12 + $0x1], 0  ;;  %s1201_s9 = smov 0   ;;  %s1203_s10 = smov 0  }
   0x7   :  { %s1205_s11 = smov 0   ;;  %s1207_s12 = smov 0  }
   0x8   :  { %s1209_s13 = smov 0   ;;  %s1211_s14 = smov 0  }
   0x9   :  { %s1213_s15 = smov 0   ;;  %s1215_s16 = smov 0  }
   0xa   :  { %s1217_s17 = smov 0   ;;  %s1219_s18 = smov 0  }
   0xb   :  { %s1221_s19 = smov 0   ;;  %s1223_s20 = smov 0  }
   0xc   :  { %s1225_s21 = smov 0  }
   0xd LB: > { %1614 = sst [smem:[#allocation15_spill]] %s1155_s15  ;;  %s36_s22 = sadd.s32 1, %s1167_s18  ;;  %s1179_s21 = sphi %s1225_s21, %s18_s21   ;;  %s1175_s20 = sphi %s1223_s20, %s1659_s20   ;;  %s1171_s19 = sphi %s1221_s19, %s1647_s19   ;;  %s1167_s18 = sphi %s1219_s18, %s1658_s18   ;;  %s1163_s17 = sphi %s1217_s17, %s1657_s17   ;;  %s1159_s16 = sphi %s1215_s16, %s1656_s16   ;;  %s1155_s15 = sphi %s1213_s15, %s1655_s15   ;;  %s1151_s14 = sphi %s1211_s14, %s1654_s14   ;;  %s1147_s13 = sphi %s1209_s13, %s1653_s13   ;;  %s1143_s12 = sphi %s1207_s12, %s1652_s12   ;;  %s1139_s11 = sphi %s1205_s11, %s1651_s11   ;;  %s1135_s10 = sphi %s1203_s10, %s1650_s10   ;;  %s1131_s9 = sphi %s1201_s9, %s1649_s9  }
   0xe   : > { %1615 = sst [smem:[#allocation16_spill]] %s1159_s16  ;;  %s40_s23 = sadd.s32 1, %s1171_s19 }
   0xf   : > { %1616 = sst [smem:[#allocation17_spill]] %s1163_s17  ;;  %p38_p0 = scmp.ge.s32.totalorder %s36_s22, 2 }
  0x10   : > { %1617 = sst [smem:[#allocation18_spill]] %s1171_s19  ;;  %s44_s24 = sadd.s32 1, %s1175_s20 }
  0x11   : > { %p64_p1 = scmp.ne.s32.totalorder %s1151_s14, %s1147_s13  ;;  %s1661_s22 = smov (%p38_p0, %s36_s22), 0 }
  0x12   : > { %1618 = sst [smem:[#allocation19_spill]] %s1661_s22  ;;  %s1663_s23 = smov (!%p38_p0, %s40_s23), %s1171_s19 }
  0x13   : > { %s49_s26 = ssub.s32 %s1167_s18, %s1661_s22  ;;  %p1609_p2 = scmp.eq.s32.totalorder %s1179_s21, 0 }
  0x14   : > { %p42_p3 = scmp.ge.s32.totalorder %s1663_s23, 2  ;;  %p1608_p6 = scmp.lt.s32.totalorder %s1179_s21, 8 }
  0x15   : > { %p1282_p5 = por %p1609_p2, %p64_p1  ;;  %s152_s29 = sand.u32 1, %s1151_s14  }
  0x16   : > { %s1665_s23 = smov (%p42_p3, %s1663_s23), 0  ;;  %s1667_s24 = smov (!%p42_p3, %s44_s24), %s1175_s20 }
  0x17   : > { %1620 = sst [smem:[#allocation20_spill]] %s1665_s23  ;;  %s1291_s28 = ssub.s32 %s1171_s19, %s1665_s23 }
  0x18   : > { %p46_p7 = scmp.ge.s32.totalorder %s1667_s24, 2  ;;  %s855_s30 = smul.u32 24, %s152_s29 }
  0x19   : > { %s856_s3 = smul.u32 3, %s1171_s19  ;;  %s1622_s17 = sadd.s32 1, %s1151_s14 }
  0x1a   : > { %s1669_s24 = smov (%p46_p7, %s1667_s24), 0  ;;  %s857_s5 = smul.u32 6, %s1167_s18 }
  0x1b   : > { %1621 = sst [smem:[#allocation21_spill]] %s1669_s24  ;;  %s1300_s4 = ssub.s32 %s1175_s20, %s1669_s24 }
  0x1c   : > { %s50_s6 = sor.u32 %s49_s26, %s1300_s4  ;;  %s858_s7 = smul.u32 12, %s1175_s20 }
  0x1d   : > { %s52_s8 = sor.u32 %s1291_s28, %s50_s6  ;;  %s163_s25 = sadd.s32 %s857_s5, %s856_s3 }
  0x1e   : > { %p55_p8 = scmp.eq.s32.totalorder %s52_s8, 0  ;;  %s165_s23 = sadd.s32 %s858_s7, %s163_s25 }
  0x1f   : > { %s840_s22 = sshll.u32 %s165_s23, 7  ;;  %s156_s2 = scalar_lea.vmem [#allocation9], %s855_s30 }
  0x20   : > { %s168_s15 = sshll.u32 %s156_s2, 4  ;;  %s1314_s24 = scalar_lea.hbm %s1597_s0, %s840_s22  ;;  %s1316_s15 = int_to_ptr.vmem [resolvable:$true] %s168_s15 }
  0x21   : > { %s1309_s16 = scalar_select %p55_p8, %s1151_s14, %s1622_s17  }
  0x22   : > { %p1322_p9 = pnand %p1608_p6, %p1282_p5  ;;  %p196_p11 = scmp.lt.s32.totalorder %s1179_s21, 9 }
  0x23   : > { %s1328_s2 = scalar_lea.sflag [#allocation10], %s152_s29  ;;  %s1009_s1 = scalar_lea.hbm %s1314_s24, 384 }
  0x24   : > { %p1010_p12 = scmp.ne.s32.totalorder %s1314_s24, %s1009_s1  ;;  %p1011_p13 = pneg %p1322_p9 }
  0x25   : > { %s1014_s22 = scalar_lea.hbm %s1597_s0, 3072  ;;  %p1015_p3 = scmp.lt.u32.totalorder %s1314_s24, %s1597_s0 }
  0x26   : > { %p1012_p0 = pnand %p1011_p13, %p1010_p12  ;;  %p1016_p5 = scmp.lt.u32.totalorder %s1014_s22, %s1009_s1 }
  0x27   : > { %p1018_p8 = scmp.lt.u32.totalorder %s1009_s1, %s1314_s24 }
  0x28   : > { %p1013_p1 = pneg %p1012_p0  ;;  %p1017_p7 = por %p1016_p5, %p1015_p3 }
  0x2a   : > { %p1019_p6 = por %p1018_p8, %p1017_p7 }
  0x2c   : > { %p1020_p2 = pnand %p1019_p6, %p1013_p1 }
  0x2e   : > { %1023 = shalt.err (!%p1020_p2)
}
  0x2f   : > { %s1024_s27 = scalar_lea.vmem %s1316_s15, 384  ;;  %s1181_s29 = smov [#allocation9]  }
  0x30   : > { %p1025_p12 = scmp.ne.s32.totalorder %s1316_s15, %s1024_s27  ;;  %s1029_s30 = sshll.u32 %s1181_s29, 4  ;;  %s1030_s30 = int_to_ptr.vmem [resolvable:$false] %s1029_s30 }
  0x31   : > { %s1031_s3 = scalar_lea.vmem %s1030_s30, 768  ;;  %p1032_p10 = scmp.lt.s32.totalorder %s1316_s15, %s1030_s30 }
  0x32   : > { %p1027_p0 = pnand %p1025_p12, %p1011_p13  ;;  %p1033_p3 = scmp.lt.s32.totalorder %s1031_s3, %s1024_s27 }
  0x34   : > { %p1028_p4 = pneg %p1027_p0  ;;  %p1034_p5 = por %p1033_p3, %p1032_p10 }
  0x36   : > { %p1035_p7 = pnand %p1034_p5, %p1028_p4 }
  0x38   : > { %1038 = shalt.err (!%p1035_p7)
}
  0x39   : > { %s1182_s5 = smov 128   ;;  %s1183_s6 = smov 8  }
  0x3a   : > { %867 = dma.hbm_to_vmem [thread:$0]  (!%p1322_p9), %s1314_s24, 384, %s1316_s15, %s1328_s2, %s1182_s5, %s1182_s5, %s1183_s6  }
  0x3b   : > { %p1624_p2 = scmp.ge.s32.totalorder %s1179_s21, 1  ;;  %s1625_s7 = sld [smem:[#allocation18_spill]] }
  0x3c   : > { %s836_s1 = sadd.s32 4294967295, %s1179_s21   ;;  %s82_s17 = sor.u32 %s1291_s28, %s1300_s4 }
  0x3d   : > { %p1360_p4 = pnand %p1624_p2, %p196_p11  ;;  %p71_p6 = scmp.eq.s32.totalorder %s836_s1, 0 }
  0x3e   : > { %p83_p10 = scmp.eq.s32.totalorder %s82_s17, 0  ;;  %s85_s19 = sadd.s32 1, %s1139_s11 }
  0x3f   : > { %p1627_p13 = scmp.ne.s32.totalorder %s1147_s13, %s1143_s12  ;;  %p92_p8 = scmp.ne.s32.totalorder %s1139_s11, %s1135_s10 }
  0x40   : > { %s1378_s15 = scalar_select %p83_p10, %s1139_s11, %s85_s19  }
  0x41   : > { %p1371_p1 = por %p71_p6, %p1627_p13  ;;  %p1629_p9 = scmp.eq.s32.totalorder %s1179_s21, 0 }
  0x42   : > { %p98_p11 = scmp.ne.s32.totalorder %s1135_s10, %s1131_s9  ;;  %s178_s24 = sand.u32 1, %s1139_s11  }
  0x43   : > { %s1628_s22 = scalar_select %p1371_p1, 1, 0 }
  0x44   : > { %p94_p12 = por %p92_p8, %p1629_p9  ;;  %s842_s23 = sshll.u32 %s1175_s20, 1 }
  0x45   : > { %p1386_p0 = por %p98_p11, %p71_p6  ;;  %s841_s28 = sshll.u32 %s178_s24, 3 }
  0x46   : > { %s187_s4 = sadd.s32 %s1625_s7, %s842_s23  ;;  %s1631_s27 = sld [smem:[#allocation22_spill]] }
  0x47   : > { %s1630_s2 = scalar_select %p1386_p0, 1, 0 }
  0x48   : > { %s843_s12 = sshll.u32 %s187_s4, 7  ;;  %s182_s30 = scalar_lea.vmem [#allocation11], %s841_s28 }
  0x49   : > { %s191_s9 = sshll.u32 %s182_s30, 4  ;;  %p1632_p3 = scmp.lt.s32.totalorder %s1179_s21, 8  ;;  %s1396_s9 = int_to_ptr.vmem [resolvable:$true] %s191_s9 }
  0x4a   : > { %s179_s5 = scalar_lea.sflag [#allocation12], %s178_s24 }
  0x4b   : > { %p1400_p5 = pnand %p1632_p3, %p94_p12 }
  0x4c   : > { %s1394_s29 = scalar_lea.hbm %s1631_s27, %s843_s12  ;;  %s1044_s17 = scalar_lea.hbm %s1631_s27, 512 }
  0x4d   : > { %s1039_s6 = scalar_lea.hbm %s1394_s29, 128  ;;  %p1041_p2 = pneg %p1400_p5 }
  0x4e   : > { %p1040_p7 = scmp.ne.s32.totalorder %s1394_s29, %s1039_s6  ;;  %p1045_p13 = scmp.lt.u32.totalorder %s1394_s29, %s1631_s27 }
  0x4f   : > { %p1046_p8 = scmp.lt.u32.totalorder %s1044_s17, %s1039_s6  ;;  %p1048_p12 = scmp.lt.u32.totalorder %s1039_s6, %s1394_s29 }
  0x50   : > { %p1042_p6 = pnand %p1041_p2, %p1040_p7 }
  0x51   : > { %p1047_p9 = por %p1046_p8, %p1045_p13 }
  0x52   : > { %p1043_p10 = pneg %p1042_p6 }
  0x53   : > { %p1049_p11 = por %p1048_p12, %p1047_p9 }
  0x55   : > { %p1050_p3 = pnand %p1049_p11, %p1043_p10 }
  0x57   : > { %1053 = shalt.err (!%p1050_p3)
}
  0x58   : > { %s1054_s24 = scalar_lea.vmem %s1396_s9, 128  ;;  %s1184_s28 = smov [#allocation11]  }
  0x59   : > { %p1055_p7 = scmp.ne.s32.totalorder %s1396_s9, %s1054_s24  ;;  %s1059_s4 = sshll.u32 %s1184_s28, 4  ;;  %s1060_s4 = int_to_ptr.vmem [resolvable:$false] %s1059_s4 }
  0x5a   : > { %s1061_s12 = scalar_lea.vmem %s1060_s4, 256  ;;  %p1062_p1 = scmp.lt.s32.totalorder %s1396_s9, %s1060_s4 }
  0x5b   : > { %p1057_p6 = pnand %p1055_p7, %p1041_p2  ;;  %p1063_p13 = scmp.lt.s32.totalorder %s1061_s12, %s1054_s24 }
  0x5d   : > { %p1058_p0 = pneg %p1057_p6  ;;  %p1064_p8 = por %p1063_p13, %p1062_p1 }
  0x5f   : > { %p1065_p9 = pnand %p1064_p8, %p1058_p0 }
  0x61   : > { %1068 = shalt.err (!%p1065_p9)
}
  0x62   : > { %870 = dma.hbm_to_vmem [thread:$0]  (!%p1400_p5), %s1394_s29, 128, %s1396_s9, %s179_s5  }
  0x63   : > { %200 = sbr.rel (%p1360_p4) target bundleno = 332 (0x14c), region = 28  ;;  %s202_s25 = sand.u32 (!%p1360_p4), 1, %s1147_s13  }
  0x64   : > { %s859_s26 = smul.u32 (!%p1360_p4), 24, %s202_s25  ;;  %s203_s30 = scalar_lea.sflag (!%p1360_p4), [#allocation10], %s202_s25 }
  0x65   : > { %p1634_p2 = scmp.ne.s32.totalorder (!%p1360_p4), %s1628_s22, 0 }
  0x66   : > { %s206_s6 = scalar_lea.vmem (!%p1360_p4), [#allocation9], %s859_s26 }
  0x6a   : > { %1122 = dma.done.wait (%p1634_p2), %s203_s30, 384  }
  0x6b   : > { %1124 = vsyncadd (%p1634_p2), %s203_s30, 4294966912  ;;  %s211_s3 = sand.u32 1, %s1135_s10   ;;  %p1635_p1 = scmp.ne.s32.totalorder %s1630_s2, 0 }
  0x6c   : > { %s845_s7 = sshll.u32 %s211_s3, 3  ;;  %s212_s1 = scalar_lea.sflag [#allocation12], %s211_s3 }
  0x6d   : > { %s215_s29 = scalar_lea.vmem [#allocation11], %s845_s7 }
  0x6e   : > { %1126 = dma.done.wait (%p1635_p1), %s212_s1, 128  }
  0x6f   : > { %1128 = vsyncadd (%p1635_p1), %s212_s1, 4294967168  ;;  %v1441_v0 = vld [vmem:[%s215_s29] sm:$0xff]  ;;  %v1445_v2 = vld [vmem:[%s206_s6 + $0x8] sm:$0xff]  ;;  %v1185_v5 = vmov 0.0   ;;  %s1640_s8 = sld [smem:[#allocation16_spill]]  ;;  %s1641_s22 = sld [smem:[#allocation17_spill]] }
  0x70   : > { %v1443_v1 = vld [vmem:[%s206_s6] sm:$0xff]  ;;  %601 = vadd.xlane.f32.xlu1 %v1441_v0  ;;  %vm383_vm1 = vcmp.gt.f32.partialorder %v1445_v2, 0.0  ;;  %v293_v4 = vand.u32 2147483647, %v1445_v2  ;;  %vm287_vm2 = vcmp.gt.f32.partialorder %v1441_v0, 0.0  ;;  %v1453_v8 = vld [vmem:[%s206_s6 + $0x10] sm:$0xff]  ;;  %v326_v27 = vmul.f32 %v1441_v0, %v1445_v2 }
  0x71   : > { %vm382_vm0 = vcmp.gt.f32.partialorder %v1443_v1, 0.0  ;;  %v292_v3 = vand.u32 2147483647, %v1443_v1  ;;  %v851_v7 = vsel %vm383_vm1, 1.0, %v1185_v5  ;;  %v294_v11 = vand.u32 2147483647, %v1453_v8 }
  0x72   : > { %v850_v6 = vsel %vm382_vm0, 1.0, %v1185_v5  ;;  %v296_v10 = vsub.f32 0.0, %v293_v4  ;;  %v1456_v12 = vsel %vm287_vm2, 1.0, %v1185_v5  ;;  %vm384_vm3 = vcmp.gt.f32.partialorder %v1453_v8, 0.0  ;;  %s1642_s2 = sld [smem:[#allocation15_spill]]  ;;  %s1643_s4 = sld [smem:[#allocation23_spill]] }
  0x73   : > { %549 = vadd.xlane.f32.xlu0 %v850_v6  ;;  %v295_v9 = vsub.f32 0.0, %v292_v3  ;;  %v297_v15 = vsub.f32 0.0, %v294_v11  ;;  %v1459_v16 = vsel %vm384_vm3, 1.0, %v1185_v5  ;;  %v323_v26 = vmax.f32 %v1445_v2, 0.0 }
  0x74   : > { %551 = vadd.xlane.f32.xlu1 %v851_v7  ;;  %v300_v14 = vmul.f32 1.442695, %v296_v10  ;;  %vm313_vm4 = vcmp.ge.f32.partialorder %v1443_v1, 0.0  ;;  %vm315_vm5 = vcmp.ge.f32.partialorder %v1453_v8, 0.0  ;;  %v392_v33 = vmul.f32 %v851_v7, %v1456_v12 }
  0x75   : > { %v298_v13 = vmul.f32 1.442695, %v295_v9  ;;  %v302_v17 = vmul.f32 1.442695, %v297_v15  ;;  %vm314_vm6 = vcmp.ge.f32.partialorder %v1445_v2, 0.0  ;;  %v391_v34 = vmul.f32 %v850_v6, %v1456_v12  ;;  %p250_p4 = scmp.lt.s32.totalorder %s1640_s8, 1 }
  0x76   : > { %v329_v37 = vsub.f32 %v323_v26, %v326_v27  ;;  %v322_v38 = vmax.f32 %v1443_v1, 0.0  ;;  %v325_v39 = vmul.f32 %v1441_v0, %v1443_v1  ;;  %v324_v3 = vmax.f32 %v1453_v8, 0.0  ;;  %p248_p0 = scmp.lt.s32.totalorder %s1641_s22, 1 }
  0x77   : > { %979 = vpow2.f32 %v298_v13  ;;  %610 = vadd.xlane.f32.xlu0 %v1456_v12  ;;  %v327_v4 = vmul.f32 %v1441_v0, %v1453_v8  ;;  %v290_v15 = vmul.f32 -0.5, %v1441_v0  ;;  %v393_v8 = vmul.f32 %v1459_v16, %v1456_v12  ;;  %s1671_s8 = smov (!%p250_p4, %s1640_s8), 1 }
  0x78   : > { %981 = vpow2.f32 %v300_v14  ;;  %553 = vadd.xlane.f32.xlu1 %v1459_v16  ;;  %v328_v9 = vsub.f32 %v322_v38, %v325_v39  ;;  %p252_p5 = scmp.lt.s32.totalorder %s1642_s2, 1  ;;  %s1673_s22 = smov (!%p248_p0, %s1641_s22), 1  ;;  %vm663_vm10 = vcmask 1041409   ;;  %vm665_vm11 = vcmask 1042434  }
  0x79   : > { %983 = vpow2.f32 %v302_v17  ;;  %s846_s9 = sshll.u32 %s1671_s8, 1  ;;  %s847_s17 = sshll.u32 %s1673_s22, 2  ;;  %vm668_vm12 = vcmask 2048   ;;  %vm676_vm13 = vcmask 10248   ;;  %vm684_vm14 = vcmask 18448  }
  0x7a   : > { %s1675_s2 = smov (!%p252_p5, %s1642_s2), 1 }
  0x7b   : > { %s255_s5 = sadd.s32 %s846_s9, %s1675_s2 }
  0x7c   : > { %s257_s19 = sadd.s32 %s847_s17, %s255_s5 }
  0x7d   : > { %s848_s23 = sshll.u32 %s257_s19, 2 }
  0x7e   : > { %s259_s12 = scalar_lea.vmem %s1643_s4, %s848_s23 }
  0x81   : > { %v980_v18 = vpop.eup %979 }
  0x82   : > { %v982_v19 = vpop.eup %981  ;;  %v304_v20 = vadd.f32 1.0, %v980_v18  ;;  %v334_v24 = vmul.f32 -0.5, %v980_v18  ;;  %v337_v44 = vand.u32 2147483647, %v980_v18 }
  0x83   : > { %v1463_v21 = vpop.eup %983  ;;  %v305_v22 = vadd.f32 1.0, %v982_v19  ;;  %v343_v25 = vmul.f32 -0.5, %v982_v19  ;;  %v346_v28 = vand.u32 2147483647, %v982_v19 }
  0x84   : > { %v306_v23 = vadd.f32 1.0, %v1463_v21  ;;  %985 = vrcp.f32 %v304_v20  ;;  %v335_v29 = vadd.f32 1.0, %v334_v24  ;;  %v352_v31 = vmul.f32 -0.5, %v1463_v21 }
  0x85   : > { %987 = vrcp.f32 %v305_v22  ;;  %v344_v30 = vadd.f32 1.0, %v343_v25  ;;  %vm1478_vm7 = vcmp.lt.f32.partialorder %v346_v28, 0.0004427343  ;;  %vm1493_vm8 = vcmp.lt.f32.partialorder %v337_v44, 0.0004427343 }
  0x86   : > { %989 = vrcp.f32 %v306_v23  ;;  %v336_v43 = vmul.f32 %v980_v18, %v335_v29  ;;  %v353_v49 = vadd.f32 1.0, %v352_v31  ;;  %v355_v63 = vand.u32 2147483647, %v1463_v21 }
  0x87   : > { %991 = vlog2.f32 %v305_v22  ;;  %v345_v48 = vmul.f32 %v982_v19, %v344_v30  ;;  %v291_v25 = vadd.f32 0.75, %v290_v15 }
  0x88   : > { %993 = vlog2.f32 %v304_v20  ;;  %v354_v14 = vmul.f32 %v1463_v21, %v353_v49  ;;  %vm356_vm9 = vcmp.lt.f32.partialorder %v355_v63, 0.0004427343 }
  0x89   : > { %995 = vlog2.f32 %v306_v23  ;;  %v330_v23 = vsub.f32 %v324_v3, %v327_v4 }
  0x8e   : > { %v986_v32 = vpop.eup %985 }
  0x8f   : > { %v988_v35 = vpop.eup %987  ;;  %v316_v36 = vsub.f32 1.0, %v986_v32 }
  0x90   : > { %v990_v40 = vpop.eup %989  ;;  %v317_v41 = vsub.f32 1.0, %v988_v35 }
  0x91   : > { %v992_v45 = vpop.eup %991  ;;  %v318_v46 = vsub.f32 1.0, %v990_v40  ;;  %v319_v47 = vsel %vm313_vm4, %v986_v32, %v316_v36 }
  0x92   : > { %v994_v50 = vpop.eup %993  ;;  %495 = vadd.xlane.f32.xlu0 %v319_v47  ;;  %v364_v51 = vadd.f32 %v319_v47, %v1441_v0  ;;  %v320_v52 = vsel %vm314_vm6, %v988_v35, %v317_v41  ;;  %v361_v53 = vmul.f32 %v319_v47, %v1441_v0  ;;  %v342_v54 = vmul.f32 0.6931472, %v992_v45 }
  0x93   : > { %v321_v55 = vsel %vm315_vm5, %v990_v40, %v318_v46  ;;  %v365_v56 = vadd.f32 %v320_v52, %v1441_v0  ;;  %v362_v57 = vmul.f32 %v320_v52, %v1441_v0  ;;  %v333_v58 = vmul.f32 0.6931472, %v994_v50  ;;  %v996_v59 = vpop.eup %995 }
  0x94   : > { %499 = vadd.xlane.f32.xlu1 %v321_v55  ;;  %v367_v60 = vmul.f32 2.0, %v361_v53  ;;  %v363_v61 = vmul.f32 %v321_v55, %v1441_v0  ;;  %v348_v2 = vsel %vm1478_vm7, %v345_v48, %v342_v54  ;;  %v366_v5 = vadd.f32 %v321_v55, %v1441_v0 }
  0x95   : > { %v368_v1 = vmul.f32 2.0, %v362_v57  ;;  %v339_v11 = vsel %vm1493_vm8, %v336_v43, %v333_v58  ;;  %v351_v13 = vmul.f32 0.6931472, %v996_v59  ;;  %v359_v17 = vadd.f32 %v348_v2, %v329_v37 }
  0x96   : > { %497 = vadd.xlane.f32.xlu0 %v320_v52  ;;  %v370_v6 = vsub.f32 %v364_v51, %v367_v60  ;;  %v369_v7 = vmul.f32 2.0, %v363_v61  ;;  %v358_v20 = vadd.f32 %v339_v11, %v328_v9 }
  0x97   : > { %v371_v10 = vsub.f32 %v365_v56, %v368_v1  ;;  %v357_v24 = vsel %vm356_vm9, %v354_v14, %v351_v13 }
  0x98   : > { %578 = vadd.xlane.f32.xlu1 %v392_v33  ;;  %v372_v19 = vsub.f32 %v366_v5, %v369_v7  ;;  %v373_v22 = vmul.f32 %v370_v6, %v370_v6  ;;  %v360_v27 = vadd.f32 %v357_v24, %v330_v23 }
  0x99   : > { %v374_v18 = vmul.f32 %v371_v10, %v371_v10 }
  0x9a   : > { %576 = vadd.xlane.f32.xlu0 %v391_v34  ;;  %v376_v21 = vmul.f32 %v373_v22, %v358_v20  ;;  %v375_v28 = vmul.f32 %v372_v19, %v372_v19 }
  0x9b   : > { %v377_v26 = vmul.f32 %v374_v18, %v359_v17 }
  0x9c   : > { %522 = vadd.xlane.f32.xlu1 %v361_v53  ;;  %v379_v29 = vmul.f32 %v376_v21, %v291_v25  ;;  %v378_v30 = vmul.f32 %v375_v28, %v360_v27 }
  0x9d   : > { %v380_v0 = vmul.f32 %v377_v26, %v291_v25 }
  0x9e   : > { %580 = vadd.xlane.f32.xlu0 %v393_v8  ;;  %v381_v12 = vmul.f32 %v378_v30, %v291_v25 }
  0xa0   : > { %526 = vadd.xlane.f32.xlu1 %v363_v61 }
  0xa2   : > { %524 = vadd.xlane.f32.xlu0 %v362_v57 }
  0xa4   : > { %470 = vadd.xlane.f32.xlu1 %v380_v0 }
  0xa6   : > { %468 = vadd.xlane.f32.xlu0 %v379_v29 }
  0xaa   : > { %472 = vadd.xlane.f32.xlu0 %v381_v12 }
  0xfd   : > { %v602_v16 = vpop.xlane.xlu1 %601 }
  0xfe   : > { %v603_v38 = vrot.slane %v602_v16, 4 }
 0x100   : > { %v550_v31 = vpop.xlane.xlu0 %549  ;;  %v604_v43 = vadd.f32 %v603_v38, %v602_v16 }
 0x101   : > { %v552_v32 = vpop.xlane.xlu1 %551  ;;  %v555_v35 = vrot.slane %v550_v31, 4 }
 0x102   : > { %v561_v36 = vrot.slane %v552_v32, 4  ;;  %v605_v48 = vrot.slane %v604_v43, 2 }
 0x103   : > { %v556_v40 = vadd.f32 %v555_v35, %v550_v31 }
 0x104   : > { %v611_v33 = vpop.xlane.xlu0 %610  ;;  %v562_v41 = vadd.f32 %v561_v36, %v552_v32  ;;  %v606_v55 = vadd.f32 %v605_v48, %v604_v43 }
 0x105   : > { %v554_v34 = vpop.xlane.xlu1 %553  ;;  %v612_v37 = vrot.slane %v611_v33, 4  ;;  %v557_v45 = vrot.slane %v556_v40, 2 }
 0x106   : > { %v567_v39 = vrot.slane %v554_v34, 4  ;;  %v563_v46 = vrot.slane %v562_v41, 2  ;;  %v607_v4 = vrot.slane %v606_v55, 1 }
 0x107   : > { %v613_v42 = vadd.f32 %v612_v37, %v611_v33  ;;  %v558_v50 = vadd.f32 %v557_v45, %v556_v40 }
 0x108   : > { %v568_v44 = vadd.f32 %v567_v39, %v554_v34  ;;  %v564_v51 = vadd.f32 %v563_v46, %v562_v41  ;;  %v608_v22 = vadd.f32 %v607_v4, %v606_v55 }
 0x109   : > { %v614_v47 = vrot.slane %v613_v42, 2  ;;  %v559_v60 = vrot.slane %v558_v50, 1 }
 0x10a   : > { %v569_v49 = vrot.slane %v568_v44, 2  ;;  %v565_v61 = vrot.slane %v564_v51, 1 }
 0x10b   : > { %v615_v52 = vadd.f32 %v614_v47, %v613_v42  ;;  %v560_v13 = vadd.f32 %v559_v60, %v558_v50 }
 0x10c   : > { %v570_v56 = vadd.f32 %v569_v49, %v568_v44  ;;  %v566_v14 = vadd.f32 %v565_v61, %v564_v51 }
 0x10d   : > { %v616_v62 = vrot.slane %v615_v52, 1 }
 0x10e   : > { %v571_v5 = vrot.slane %v570_v56, 1 }
 0x10f   : > { %v617_v15 = vadd.f32 %v616_v62, %v615_v52 }
 0x110   : > { %v572_v23 = vadd.f32 %v571_v5, %v570_v56 }
 0x111   : > { %v646_v0 = vadd.f32 %v617_v15, %v566_v14  ;;  %v645_v29 = vadd.f32 %v617_v15, %v560_v13 }
 0x112   : > { %v1510_v35 = vadd.f32 %v617_v15, %v572_v23 }
 0x11f   : > { %v496_v53 = vpop.xlane.xlu0 %495 }
 0x120   : > { %v501_v54 = vrot.slane %v496_v53, 4 }
 0x121   : > { %v500_v57 = vpop.xlane.xlu1 %499 }
 0x122   : > { %v513_v58 = vrot.slane %v500_v57, 4  ;;  %v502_v59 = vadd.f32 %v501_v54, %v496_v53 }
 0x123   : > { %v498_v63 = vpop.xlane.xlu0 %497 }
 0x124   : > { %v514_v1 = vadd.f32 %v513_v58, %v500_v57  ;;  %v503_v2 = vrot.slane %v502_v59, 2  ;;  %v507_v3 = vrot.slane %v498_v63, 4 }
 0x125   : > { %v579_v6 = vpop.xlane.xlu1 %578 }
 0x126   : > { %v515_v7 = vrot.slane %v514_v1, 2  ;;  %v504_v9 = vadd.f32 %v503_v2, %v502_v59  ;;  %v588_v10 = vrot.slane %v579_v6, 4  ;;  %v508_v11 = vadd.f32 %v507_v3, %v498_v63 }
 0x127   : > { %v577_v17 = vpop.xlane.xlu0 %576 }
 0x128   : > { %v516_v8 = vadd.f32 %v515_v7, %v514_v1  ;;  %v505_v18 = vrot.slane %v504_v9, 1  ;;  %v589_v19 = vadd.f32 %v588_v10, %v579_v6  ;;  %v509_v20 = vrot.slane %v508_v11, 2 }
 0x129   : > { %v582_v24 = vrot.slane %v577_v17, 4  ;;  %v523_v25 = vpop.xlane.xlu1 %522 }
 0x12a   : > { %v517_v26 = vrot.slane %v516_v8, 1  ;;  %v506_v21 = vadd.f32 %v505_v18, %v504_v9  ;;  %v590_v27 = vrot.slane %v589_v19, 2  ;;  %v510_v28 = vadd.f32 %v509_v20, %v508_v11 }
 0x12b   : > { %v583_v30 = vadd.f32 %v582_v24, %v577_v17  ;;  %v528_v12 = vrot.slane %v523_v25, 4  ;;  %v581_v16 = vpop.xlane.xlu0 %580 }
 0x12c   : > { %v518_v31 = vadd.f32 %v517_v26, %v516_v8  ;;  %v627_v32 = vadd.f32 %v608_v22, %v506_v21  ;;  %v591_v33 = vadd.f32 %v590_v27, %v589_v19  ;;  %v511_v34 = vrot.slane %v510_v28, 1 }
 0x12d   : > { %v584_v36 = vrot.slane %v583_v30, 2  ;;  %v529_v37 = vadd.f32 %v528_v12, %v523_v25  ;;  %v594_v38 = vrot.slane %v581_v16, 4  ;;  %v527_v39 = vpop.xlane.xlu1 %526 }
 0x12e   : > { %v629_v40 = vadd.f32 %v608_v22, %v518_v31  ;;  %v630_v41 = vadd.f32 1.0, %v627_v32  ;;  %v592_v42 = vrot.slane %v591_v33, 1  ;;  %v512_v43 = vadd.f32 %v511_v34, %v510_v28 }
 0x12f   : > { %v585_v44 = vadd.f32 %v584_v36, %v583_v30  ;;  %v530_v45 = vrot.slane %v529_v37, 2  ;;  %v595_v46 = vadd.f32 %v594_v38, %v581_v16  ;;  %v540_v47 = vrot.slane %v527_v39, 4  ;;  %v525_v48 = vpop.xlane.xlu0 %524 }
 0x130   : > { %v632_v49 = vadd.f32 1.0, %v629_v40  ;;  %997 = vrcp.f32 %v630_v41  ;;  %v1512_v50 = vadd.f32 %v592_v42, %v591_v33  ;;  %v628_v51 = vadd.f32 %v608_v22, %v512_v43 }
 0x131   : > { %v586_v52 = vrot.slane %v585_v44, 1  ;;  %v531_v53 = vadd.f32 %v530_v45, %v529_v37  ;;  %v596_v54 = vrot.slane %v595_v46, 2  ;;  %v541_v55 = vadd.f32 %v540_v47, %v527_v39  ;;  %v471_v56 = vpop.xlane.xlu1 %470 }
 0x132   : > { %999 = vrcp.f32 %v632_v49  ;;  %v649_v57 = vsub.f32 %v646_v0, %v1512_v50  ;;  %v631_v58 = vadd.f32 1.0, %v628_v51  ;;  %v534_v59 = vrot.slane %v525_v48, 4 }
 0x133   : > { %v1517_v60 = vadd.f32 %v586_v52, %v585_v44  ;;  %v532_v61 = vrot.slane %v531_v53, 1  ;;  %v597_v62 = vadd.f32 %v596_v54, %v595_v46  ;;  %v542_v63 = vrot.slane %v541_v55, 2  ;;  %v469_v1 = vpop.xlane.xlu0 %468 }
 0x134   : > { %v652_v2 = vmax.f32 %v649_v57, 1.0  ;;  %1001 = vrcp.f32 %v631_v58  ;;  %v535_v3 = vadd.f32 %v534_v59, %v525_v48  ;;  %v480_v4 = vrot.slane %v471_v56, 4 }
 0x135   : > { %v648_v5 = vsub.f32 %v645_v29, %v1517_v60  ;;  %v533_v6 = vadd.f32 %v532_v61, %v531_v53  ;;  %v598_v7 = vrot.slane %v597_v62, 1  ;;  %v543_v9 = vadd.f32 %v542_v63, %v541_v55 }
 0x136   : > { %1003 = vrcp.f32 %v652_v2  ;;  %v536_v10 = vrot.slane %v535_v3, 2  ;;  %v481_v11 = vadd.f32 %v480_v4, %v471_v56  ;;  %v474_v13 = vrot.slane %v469_v1, 4 }
 0x137   : > { %v651_v14 = vmax.f32 %v648_v5, 1.0  ;;  %v621_v15 = vmul.f32 2.0, %v533_v6  ;;  %v1531_v17 = vadd.f32 %v598_v7, %v597_v62  ;;  %v544_v8 = vrot.slane %v543_v9, 1  ;;  %v473_v18 = vpop.xlane.xlu0 %472 }
 0x138   : > { %v537_v19 = vadd.f32 %v536_v10, %v535_v3  ;;  %v482_v20 = vrot.slane %v481_v11, 2  ;;  %v475_v22 = vadd.f32 %v474_v13, %v469_v1  ;;  %v486_v23 = vrot.slane %v473_v18, 4 }
 0x139   : > { %1005 = vrcp.f32 %v651_v14  ;;  %v650_v24 = vsub.f32 %v1510_v35, %v1531_v17  ;;  %v545_v25 = vadd.f32 %v544_v8, %v543_v9  ;;  %v624_v29 = vadd.f32 1.0, %v621_v15 }
 0x13a   : > { %v998_v26 = vpop.eup %997  ;;  %v538_v21 = vrot.slane %v537_v19, 1  ;;  %v483_v27 = vadd.f32 %v482_v20, %v481_v11  ;;  %v476_v28 = vrot.slane %v475_v22, 2  ;;  %v487_v0 = vadd.f32 %v486_v23, %v473_v18 }
 0x13b   : > { %v653_v30 = vmax.f32 %v650_v24, 1.0  ;;  %v623_v12 = vmul.f32 2.0, %v545_v25  ;;  %v634_v35 = vmul.f32 %v998_v26, %v624_v29 }
 0x13c   : > { %v1000_v16 = vpop.eup %999  ;;  %v539_v31 = vadd.f32 %v538_v21, %v537_v19  ;;  %v484_v32 = vrot.slane %v483_v27, 1  ;;  %v477_v33 = vadd.f32 %v476_v28, %v475_v22  ;;  %v488_v34 = vrot.slane %v487_v0, 2 }
 0x13d   : > { %1007 = vrcp.f32 %v653_v30  ;;  %v626_v36 = vadd.f32 1.0, %v623_v12  ;;  %v639_v47 = vsub.f32 1.0, %v634_v35 }
 0x13e   : > { %v1002_v37 = vpop.eup %1001  ;;  %v622_v38 = vmul.f32 2.0, %v539_v31  ;;  %v478_v39 = vrot.slane %v477_v33, 1  ;;  %v489_v40 = vadd.f32 %v488_v34, %v487_v0  ;;  %v485_v42 = vadd.f32 %v484_v32, %v483_v27 }
 0x13f   : > { %v638_v41 = vmul.f32 %v1000_v16, %v626_v36  ;;  %v642_v59 = vmul.f32 0.5, %v639_v47 }
 0x140   : > { %v1004_v43 = vpop.eup %1003  ;;  %v625_v44 = vadd.f32 1.0, %v622_v38  ;;  %v479_v45 = vadd.f32 %v478_v39, %v477_v33  ;;  %v490_v46 = vrot.slane %v489_v40, 1  ;;  %v619_v54 = vmul.f32 0.00048828125, %v485_v42 }
 0x141   : > { %v641_v53 = vsub.f32 1.0, %v638_v41  ;;  %v657_v1 = vmul.f32 %v1004_v43, %v1512_v50 }
 0x142   : > { %v636_v48 = vmul.f32 %v1002_v37, %v625_v44  ;;  %v618_v49 = vmul.f32 0.00048828125, %v479_v45  ;;  %v491_v51 = vadd.f32 %v490_v46, %v489_v40 }
 0x143   : > { %v1006_v52 = vpop.eup %1005  ;;  %v644_v2 = vmul.f32 0.5, %v641_v53 }
 0x144   : > { %v640_v55 = vsub.f32 1.0, %v636_v48  ;;  %v620_v56 = vmul.f32 0.00048828125, %v491_v51  ;;  %v655_v57 = vmul.f32 %v1006_v52, %v1517_v60  ;;  %v664_v58 = vsel %vm663_vm10, %v619_v54, %v618_v49 }
 0x146   : > { %v643_v61 = vmul.f32 0.5, %v640_v55  ;;  %v666_v62 = vsel %vm665_vm11, %v620_v56, %v664_v58  ;;  %v681_v5 = vsel %vm663_vm10, %v657_v1, %v655_v57 }
 0x147   : > { %v1008_v63 = vpop.eup %1007  ;;  %669 = vst.msk [vmem:[%s259_s12] sm:$0x7] %vm668_vm12, %v666_v62 }
 0x148   : > { %v659_v3 = vmul.f32 %v1008_v63, %v1531_v17  ;;  %v673_v4 = vsel %vm663_vm10, %v643_v61, %v642_v59 }
 0x149   : > { %v674_v60 = vsel %vm665_vm11, %v644_v2, %v673_v4 }
 0x14a   : > { %v682_v6 = vsel %vm665_vm11, %v659_v3, %v681_v5  ;;  %677 = vst.msk [vmem:[%s259_s12] sm:$0x7] %vm676_vm13, %v674_v60 }
 0x14b   : > { %685 = vst.msk [vmem:[%s259_s12] sm:$0x7] %vm684_vm14, %v682_v6 }
 0x14c PF: > { %s18_s21 = sadd.s32 1, %s1179_s21   ;;  %s1645_s26 = sld [smem:[#allocation18_spill]] }
 0x14d   : > { %p1553_p10 = scmp.ge.s32.totalorder %s18_s21, 10   ;;  %s1646_s30 = sld [smem:[#allocation19_spill]] }
 0x14e   : > { %s1647_s19 = sld [smem:[#allocation20_spill]]  ;;  %s1648_s6 = sld [smem:[#allocation21_spill]] }
 0x14f   : > { %s1649_s9 = smov %s1135_s10  ;;  %s1650_s10 = smov %s1139_s11 }
 0x150   : > { %s1651_s11 = smov %s1378_s15  ;;  %s1652_s12 = smov %s1147_s13 }
 0x151   : > { %s1653_s13 = smov %s1151_s14  ;;  %s1654_s14 = smov %s1309_s16 }
 0x152   : > { %s1655_s15 = smov %s1167_s18  ;;  %s1656_s16 = smov %s1645_s26 }
 0x153   : > { %s1657_s17 = smov %s1175_s20  ;;  %s1658_s18 = smov %s1646_s30 }
 0x154   : > { %s1659_s20 = smov %s1648_s6  ;;  %17 = sbr.rel (!%p1553_p10) target bundleno = 13 (0xd), region = 90 }
 0x15b   :  { %721 = vsyncpa [#allocation10], 1 }
 0x15c   :  { %723 = vsyncpa [#allocation10 + $0x1], 1 }
 0x15d   :  { %724 = vsyncpa [#allocation12], 1 }
 0x15e   :  { %726 = vsyncpa [#allocation12 + $0x1], 1 }

</bundles_post_ra>
